<compile_context>
chip_gen: v5e
topology: v5e:2x2
jax: 0.10.0
libtpu: 0.0.40
codegen_flags: <defaults>
</compile_context>

<pallas_src>
import functools
import math

import jax
import jax.numpy as jnp
from jax.experimental import pallas as pl
from jax.experimental.pallas import tpu as pltpu


# ----------------------------------------------------------------------------
# fused kernel
# ----------------------------------------------------------------------------

def _layernorm(x, gamma, beta, eps=1e-5):
    mu = jnp.mean(x, axis=-1, keepdims=True)
    var = jnp.mean(jnp.square(x - mu), axis=-1, keepdims=True)
    return (x - mu) * jax.lax.rsqrt(var + eps) * gamma + beta


def fused_bert_kernel(emb_ref, wemb_ref, bemb_ref,
                      wq_ref, wk_ref, wv_ref, bq_ref, bk_ref, bv_ref,
                      wo_ref, bo_ref,
                      w1_ref, b1_ref, w2_ref, b2_ref,
                      g1_ref, be1_ref, g2_ref, be2_ref,
                      head_w_ref, head_b_ref,
                      o_ref, x_ref, *, n_head, seq):
    f32, bf16 = jnp.float32, jnp.bfloat16
    D = wo_ref.shape[0]
    H, S = n_head, seq
    hd = D // H
    scale = 1.0 / math.sqrt(hd)
    inv_sqrt2 = 1.0 / math.sqrt(2.0)

    layer = pl.program_id(1)
    n_layers = pl.num_programs(1)

    # --- layer 0: embedding projection into the resident activation scratch --
    @pl.when(layer == 0)
    def _():
        x_ref[...] = (jnp.dot(emb_ref[0], wemb_ref[...],
                              preferred_element_type=f32) + bemb_ref[...])

    x = x_ref[...]                                            # (S, D) f32

    # ----------- multi-head self-attention (heads on leading batch dim) -----
    xbh = jnp.broadcast_to(x.astype(bf16), (H, S, D))          # (H, S, D)
    dn_proj = (((2,), (1,)), ((0,), (0,)))                     # contract D, batch H
    q = jax.lax.dot_general(xbh, wq_ref[...], dn_proj,
                            preferred_element_type=f32) + bq_ref[...]   # (H,S,hd)
    k = jax.lax.dot_general(xbh, wk_ref[...], dn_proj,
                            preferred_element_type=f32) + bk_ref[...]
    v = jax.lax.dot_general(xbh, wv_ref[...], dn_proj,
                            preferred_element_type=f32) + bv_ref[...]

    s = jax.lax.dot_general(q.astype(bf16), k.astype(bf16),
                            (((2,), (2,)), ((0,), (0,))),
                            preferred_element_type=f32) * scale         # (H,S,S)
    s = s - jnp.max(s, axis=-1, keepdims=True)
    p = jnp.exp(s)
    p = p * pl.reciprocal(jnp.sum(p, axis=-1, keepdims=True), approx=True)
    ctx = jax.lax.dot_general(p.astype(bf16), v.astype(bf16),
                              (((2,), (1,)), ((0,), (0,))),
                              preferred_element_type=f32)               # (H,S,hd)
    # lane-contiguous (S, D) context -> ONE K=128 output projection
    ctx_flat = jnp.concatenate([ctx[h] for h in range(H)], axis=-1)     # (S, D)
    attn = jnp.dot(ctx_flat.astype(bf16), wo_ref[...],
                   preferred_element_type=f32) + bo_ref[...]

    x = _layernorm(x + attn, g1_ref[0], be1_ref[0])            # dropout1 = id

    # ----------- feed-forward (exact GELU) + residual + norm2 ---------------
    h1 = jnp.dot(x.astype(bf16), w1_ref[0],
                 preferred_element_type=f32) + b1_ref[0]       # (S, d_ff)
    h1 = 0.5 * h1 * (1.0 + jax.lax.erf(h1 * inv_sqrt2))
    h2 = jnp.dot(h1.astype(bf16), w2_ref[0],
                 preferred_element_type=f32) + b2_ref[0]       # (S, D)
    x = _layernorm(x + h2, g2_ref[0], be2_ref[0])              # dropout2 = id

    x_ref[...] = x

    # --- last layer: Linear(d_model, 1), emitted lane-dense as a (1, S) row --
    @pl.when(layer == n_layers - 1)
    def _():
        row = jax.lax.dot_general(head_w_ref[...], x,
                                  (((1,), (1,)), ((), ())),
                                  preferred_element_type=f32)   # (1, S)
        o_ref[...] = (row + head_b_ref[0, 0]).reshape(1, 1, S)


# ----------------------------------------------------------------------------
# parameters (PyTorch conventions) + kernel-side preparation
# ----------------------------------------------------------------------------

def init_params(key, *, vocab, n_hour, n_weekday, n_loc,
                d_embedding, d_model, n_head, d_ff, n_layers):
    ks = iter(jax.random.split(key, 16 + 4 * n_layers))
    s = 0.02

    def nrm(shape):
        return s * jax.random.normal(next(ks), shape, dtype=jnp.float32)

    p = {
        # CustomEmbedding (assumed structure)
        'tok_emb': nrm((vocab, d_embedding)),
        'hour_emb': nrm((n_hour, d_embedding)),
        'wday_emb': nrm((n_weekday, d_embedding)),
        'loc_emb': nrm((n_loc, d_embedding)),
        'emb_w': nrm((d_model, d_embedding)),       # nn.Linear: (out, in)
        'emb_b': nrm((d_model,)),
        # shared MultiheadAttention (single instance reused by all layers)
        'wqkv': nrm((3 * d_model, d_model)),
        'bqkv': nrm((3 * d_model,)),
        'wo': nrm((d_model, d_model)),
        'bo': nrm((d_model,)),
        # final head
        'head_w': nrm((1, d_model)),
        'head_b': nrm((1,)),
        'layers': [],
    }
    for _ in range(n_layers):
        p['layers'].append({
            'w1': nrm((d_ff, d_model)),
            'b1': nrm((d_ff,)),
            'w2': nrm((d_model, d_ff)),
            'b2': nrm((d_model,)),
            'g1': jnp.ones((d_model,), jnp.float32),
            'be1': jnp.zeros((d_model,), jnp.float32),
            'g2': jnp.ones((d_model,), jnp.float32),
            'be2': jnp.zeros((d_model,), jnp.float32),
        })
    return p


def prepare_kernel_params(p, n_head):
    """Head-major (H, D, hd) Q/K/V weights, (in, out) transposes, bf16 matmul
    operands, per-layer params stacked along a leading layer axis."""
    bf16, f32 = jnp.bfloat16, jnp.float32
    D = p['wo'].shape[0]
    H = n_head
    hd = D // H
    L = len(p['layers'])

    def head_major(w):                      # (D out-feats, D in) -> (H, D, hd)
        return jnp.transpose(w.reshape(H, hd, D), (0, 2, 1))

    wqkv, bqkv = p['wqkv'], p['bqkv']
    stack = lambda key: jnp.stack([lyr[key] for lyr in p['layers']])
    return {
        'wemb': p['emb_w'].T.astype(bf16),                   # (De, D)
        'bemb': p['emb_b'].reshape(1, D).astype(f32),        # (1, D)
        'wq': head_major(wqkv[0 * D:1 * D]).astype(bf16),    # (H, D, hd)
        'wk': head_major(wqkv[1 * D:2 * D]).astype(bf16),
        'wv': head_major(wqkv[2 * D:3 * D]).astype(bf16),
        'bq': bqkv[0 * D:1 * D].reshape(H, 1, hd).astype(f32),
        'bk': bqkv[1 * D:2 * D].reshape(H, 1, hd).astype(f32),
        'bv': bqkv[2 * D:3 * D].reshape(H, 1, hd).astype(f32),
        'wo': p['wo'].T.astype(bf16),                        # (D, D)
        'bo': p['bo'].reshape(1, D).astype(f32),             # (1, D)
        'w1': jnp.stack([l['w1'].T for l in p['layers']]).astype(bf16),  # (L,D,F)
        'b1': stack('b1').reshape(L, 1, -1).astype(f32),                 # (L,1,F)
        'w2': jnp.stack([l['w2'].T for l in p['layers']]).astype(bf16),  # (L,F,D)
        'b2': stack('b2').reshape(L, 1, -1).astype(f32),                 # (L,1,D)
        'g1': stack('g1').reshape(L, 1, -1).astype(f32),
        'be1': stack('be1').reshape(L, 1, -1).astype(f32),
        'g2': stack('g2').reshape(L, 1, -1).astype(f32),
        'be2': stack('be2').reshape(L, 1, -1).astype(f32),
        'head_w': p['head_w'].astype(f32),                   # (1, D)
        'head_b': p['head_b'].reshape(1, 1).astype(f32),     # (1, 1) -> SMEM
    }


# ----------------------------------------------------------------------------
# forward
# ----------------------------------------------------------------------------

def little_bert_forward(params, sequence, hour, weekday, location, *, n_head):
    B, S = sequence.shape
    n_layers = len(params['layers'])
    D = params['wo'].shape[0]
    De = params['emb_w'].shape[1]
    F = params['layers'][0]['w1'].shape[0]

    # TODO(synk): CustomEmbedding internals assumed (4 summed lookups + Linear).
    emb = (params['tok_emb'][sequence]
           + params['hour_emb'][hour]
           + params['wday_emb'][weekday]
           + params['loc_emb'][location]).astype(jnp.bfloat16)   # (B, S, De)

    kp = prepare_kernel_params(params, n_head)

    def const(shape):
        nd = len(shape)
        return pl.BlockSpec(shape, lambda b, l: (0,) * nd)

    def per_layer(shape):
        return pl.BlockSpec((1,) + shape, lambda b, l: (l,) + (0,) * len(shape))

    hd = D // n_head
    in_specs = [
        pl.BlockSpec((1, S, De), lambda b, l: (b, 0, 0)),   # emb
        const((De, D)),                                     # wemb
        const((1, D)),                                      # bemb
        const((n_head, D, hd)),                             # wq
        const((n_head, D, hd)),                             # wk
        const((n_head, D, hd)),                             # wv
        const((n_head, 1, hd)),                             # bq
        const((n_head, 1, hd)),                             # bk
        const((n_head, 1, hd)),                             # bv
        const((D, D)),                                      # wo
        const((1, D)),                                      # bo
        per_layer((D, F)),                                  # w1
        per_layer((1, F)),                                  # b1
        per_layer((F, D)),                                  # w2
        per_layer((1, D)),                                  # b2
        per_layer((1, D)),                                  # g1
        per_layer((1, D)),                                  # be1
        per_layer((1, D)),                                  # g2
        per_layer((1, D)),                                  # be2
        const((1, D)),                                      # head_w
        pl.BlockSpec(memory_space=pltpu.MemorySpace.SMEM),  # head_b scalar
    ]

    # --- VMEM budget from the actual per-step footprint (review item 5) -----
    def _nbytes(a):
        return int(a.size) * a.dtype.itemsize
    shared_keys = ('wemb', 'bemb', 'wq', 'wk', 'wv', 'bq', 'bk', 'bv',
                   'wo', 'bo', 'head_w', 'head_b')
    layer_keys = ('w1', 'b1', 'w2', 'b2', 'g1', 'be1', 'g2', 'be2')
    shared_b = sum(_nbytes(kp[k]) for k in shared_keys)
    layer_blk_b = sum(_nbytes(kp[k]) for k in layer_keys) // n_layers
    io_blk_b = S * De * 2 + S * 4          # one emb block (bf16) + one out row
    scratch_b = S * D * 4
    footprint = shared_b + 2 * (layer_blk_b + io_blk_b) + scratch_b
    vmem_limit = int(min(max(2 * footprint, 4 << 20), 32 << 20))

    kernel = functools.partial(fused_bert_kernel, n_head=n_head, seq=S)

    out = pl.pallas_call(
        kernel,
        out_shape=jax.ShapeDtypeStruct((B, 1, S), jnp.float32),
        grid=(B, n_layers),
        in_specs=in_specs,
        out_specs=pl.BlockSpec((1, 1, S), lambda b, l: (b, 0, 0)),
        scratch_shapes=[pltpu.VMEM((S, D), jnp.float32)],   # resident activations
        compiler_params=pltpu.CompilerParams(
            dimension_semantics=("parallel", "arbitrary"),
            vmem_limit_bytes=vmem_limit),
    )(emb, kp['wemb'], kp['bemb'],
      kp['wq'], kp['wk'], kp['wv'], kp['bq'], kp['bk'], kp['bv'],
      kp['wo'], kp['bo'],
      kp['w1'], kp['b1'], kp['w2'], kp['b2'],
      kp['g1'], kp['be1'], kp['g2'], kp['be2'],
      kp['head_w'], kp['head_b'])

    return out.reshape(B, S)   # Linear(d_model, 1).squeeze(2)


# ----------------------------------------------------------------------------
# main
# ----------------------------------------------------------------------------

if __name__ == "__main__":
    # small, forward-consistent shapes (lane-friendly d_model / d_ff; for
    # production, prefer multiples of 256 on v6e/v7x and row tiles >= 256)
    B, S = 2, 8
    vocab, n_hour, n_weekday, n_loc = 50, 24, 7, 10
    d_embedding, d_model, n_head, d_ff, n_layers = 64, 128, 4, 256, 2
    assert d_model % n_head == 0

    key = jax.random.PRNGKey(0)
    kparam, k1, k2, k3, k4 = jax.random.split(key, 5)

    params = init_params(kparam, vocab=vocab, n_hour=n_hour,
                         n_weekday=n_weekday, n_loc=n_loc,
                         d_embedding=d_embedding, d_model=d_model,
                         n_head=n_head, d_ff=d_ff, n_layers=n_layers)

    sequence = jax.random.randint(k1, (B, S), 3, vocab, dtype=jnp.int32)
    hour = jax.random.randint(k2, (B, S), 0, n_hour, dtype=jnp.int32)
    weekday = jax.random.randint(k3, (B, S), 0, n_weekday, dtype=jnp.int32)
    location = jax.random.randint(k4, (B, S), 0, n_loc, dtype=jnp.int32)

    fwd = jax.jit(functools.partial(little_bert_forward, n_head=n_head))
    out = jax.block_until_ready(fwd(params, sequence, hour, weekday, location))

    assert out.shape == (B, S), out.shape
    assert bool(jnp.all(jnp.isfinite(out)))
    print("KERNEL_OK")
</pallas_src>

<mosaic_0001>
module attributes {stable_mosaic.version = 11 : i64} {
  func.func @fused_bert_kernel(%arg0: i32, %arg1: i32, %arg2: memref<1x8x64xbf16, #tpu.memory_space<vmem>>, %arg3: memref<64x128xbf16, #tpu.memory_space<vmem>>, %arg4: memref<1x128xf32, #tpu.memory_space<vmem>>, %arg5: memref<4x128x32xbf16, #tpu.memory_space<vmem>>, %arg6: memref<4x128x32xbf16, #tpu.memory_space<vmem>>, %arg7: memref<4x128x32xbf16, #tpu.memory_space<vmem>>, %arg8: memref<4x1x32xf32, #tpu.memory_space<vmem>>, %arg9: memref<4x1x32xf32, #tpu.memory_space<vmem>>, %arg10: memref<4x1x32xf32, #tpu.memory_space<vmem>>, %arg11: memref<128x128xbf16, #tpu.memory_space<vmem>>, %arg12: memref<1x128xf32, #tpu.memory_space<vmem>>, %arg13: memref<1x128x256xbf16, #tpu.memory_space<vmem>>, %arg14: memref<1x1x256xf32, #tpu.memory_space<vmem>>, %arg15: memref<1x256x128xbf16, #tpu.memory_space<vmem>>, %arg16: memref<1x1x128xf32, #tpu.memory_space<vmem>>, %arg17: memref<1x1x128xf32, #tpu.memory_space<vmem>>, %arg18: memref<1x1x128xf32, #tpu.memory_space<vmem>>, %arg19: memref<1x1x128xf32, #tpu.memory_space<vmem>>, %arg20: memref<1x1x128xf32, #tpu.memory_space<vmem>>, %arg21: memref<1x128xf32, #tpu.memory_space<vmem>>, %arg22: memref<1x1xf32, #tpu.memory_space<smem>>, %arg23: memref<1x1x8xf32, #tpu.memory_space<vmem>>, %arg24: memref<8x128xf32, #tpu.memory_space<vmem>>) attributes {dimension_semantics = [#tpu.dimension_semantics<parallel>, #tpu.dimension_semantics<arbitrary>], iteration_bounds = array<i64: 2, 2>, scalar_prefetch = 0 : i64, scratch_operands = 1 : i64, tpu.core_type = #tpu.core_type<tc>, window_params = [{transform_indices = @transform_0, window_bounds = array<i64: 1, 8, 64>}, {pipeline_mode = #tpu.pipeline_mode<synchronous>, transform_indices = @transform_1, window_bounds = array<i64: 64, 128>}, {pipeline_mode = #tpu.pipeline_mode<synchronous>, transform_indices = @transform_2, window_bounds = array<i64: 1, 128>}, {pipeline_mode = #tpu.pipeline_mode<synchronous>, transform_indices = @transform_3, window_bounds = array<i64: 4, 128, 32>}, {pipeline_mode = #tpu.pipeline_mode<synchronous>, transform_indices = @transform_4, window_bounds = array<i64: 4, 128, 32>}, {pipeline_mode = #tpu.pipeline_mode<synchronous>, transform_indices = @transform_5, window_bounds = array<i64: 4, 128, 32>}, {pipeline_mode = #tpu.pipeline_mode<synchronous>, transform_indices = @transform_6, window_bounds = array<i64: 4, 1, 32>}, {pipeline_mode = #tpu.pipeline_mode<synchronous>, transform_indices = @transform_7, window_bounds = array<i64: 4, 1, 32>}, {pipeline_mode = #tpu.pipeline_mode<synchronous>, transform_indices = @transform_8, window_bounds = array<i64: 4, 1, 32>}, {pipeline_mode = #tpu.pipeline_mode<synchronous>, transform_indices = @transform_9, window_bounds = array<i64: 128, 128>}, {pipeline_mode = #tpu.pipeline_mode<synchronous>, transform_indices = @transform_10, window_bounds = array<i64: 1, 128>}, {transform_indices = @transform_11, window_bounds = array<i64: 1, 128, 256>}, {transform_indices = @transform_12, window_bounds = array<i64: 1, 1, 256>}, {transform_indices = @transform_13, window_bounds = array<i64: 1, 256, 128>}, {transform_indices = @transform_14, window_bounds = array<i64: 1, 1, 128>}, {transform_indices = @transform_15, window_bounds = array<i64: 1, 1, 128>}, {transform_indices = @transform_16, window_bounds = array<i64: 1, 1, 128>}, {transform_indices = @transform_17, window_bounds = array<i64: 1, 1, 128>}, {transform_indices = @transform_18, window_bounds = array<i64: 1, 1, 128>}, {pipeline_mode = #tpu.pipeline_mode<synchronous>, transform_indices = @transform_19, window_bounds = array<i64: 1, 128>}, {transform_indices = @transform_20, window_bounds = array<i64: 1, 1>}, {transform_indices = @transform_21, window_bounds = array<i64: 1, 1, 8>}]} {
    %c0_i32 = arith.constant 0 : i32
    %0 = arith.cmpi eq, %arg1, %c0_i32 : i32
    %1 = arith.extui %0 : i1 to i32
    %c0_i32_0 = arith.constant 0 : i32
    %2 = arith.cmpi ne, %1, %c0_i32_0 : i32
    scf.if %2 {
      %c0_74 = arith.constant 0 : index
      %c0_75 = arith.constant 0 : index
      %c0_76 = arith.constant 0 : index
      %137 = vector.load %arg2[%c0_74, %c0_75, %c0_76] : memref<1x8x64xbf16, #tpu.memory_space<vmem>>, vector<1x8x64xbf16>
      %138 = vector.shape_cast %137 : vector<1x8x64xbf16> to vector<8x64xbf16>
      %c0_77 = arith.constant 0 : index
      %c0_78 = arith.constant 0 : index
      %139 = vector.load %arg3[%c0_77, %c0_78] : memref<64x128xbf16, #tpu.memory_space<vmem>>, vector<64x128xbf16>
      %cst_79 = arith.constant dense<0.000000e+00> : vector<8x128xf32>
      %140 = tpu.matmul %138, %139, %cst_79 {dimension_numbers = #tpu.dot_dimension_numbers<[1], [0], [0], [1], [0, 0, 1, 1], [], []>} : vector<8x64xbf16>, vector<64x128xbf16>, vector<8x128xf32> -> vector<8x128xf32>
      %c0_80 = arith.constant 0 : index
      %c0_81 = arith.constant 0 : index
      %141 = vector.load %arg4[%c0_80, %c0_81] : memref<1x128xf32, #tpu.memory_space<vmem>>, vector<1x128xf32>
      %142 = vector.broadcast %141 : vector<1x128xf32> to vector<8x128xf32>
      %143 = arith.addf %140, %142 : vector<8x128xf32>
      %c0_82 = arith.constant 0 : index
      %c0_83 = arith.constant 0 : index
      %144 = vector.load %arg24[%c0_82, %c0_83] : memref<8x128xf32, #tpu.memory_space<vmem>>, vector<8x128xf32>
      tpu.vector_store %arg24[%c0_82, %c0_83], %143 {strides = array<i32>} : memref<8x128xf32, #tpu.memory_space<vmem>>, vector<8x128xf32>,
    } else {
    }
    %c0 = arith.constant 0 : index
    %c0_1 = arith.constant 0 : index
    %3 = vector.load %arg24[%c0, %c0_1] : memref<8x128xf32, #tpu.memory_space<vmem>>, vector<8x128xf32>
    %4 = arith.truncf %3 : vector<8x128xf32> to vector<8x128xbf16>
    %5 = vector.shape_cast %4 : vector<8x128xbf16> to vector<1x8x128xbf16>
    %6 = vector.broadcast %5 : vector<1x8x128xbf16> to vector<4x8x128xbf16>
    %c0_2 = arith.constant 0 : index
    %c0_3 = arith.constant 0 : index
    %c0_4 = arith.constant 0 : index
    %7 = vector.load %arg5[%c0_2, %c0_3, %c0_4] : memref<4x128x32xbf16, #tpu.memory_space<vmem>>, vector<4x128x32xbf16>
    %cst = arith.constant dense<0.000000e+00> : vector<4x8x32xf32>
    %8 = tpu.matmul %6, %7, %cst {dimension_numbers = #tpu.dot_dimension_numbers<[2], [1], [1], [2], [0, 0, 0, 1, 1, 2], [0], [0]>} : vector<4x8x128xbf16>, vector<4x128x32xbf16>, vector<4x8x32xf32> -> vector<4x8x32xf32>
    %c0_5 = arith.constant 0 : index
    %c0_6 = arith.constant 0 : index
    %c0_7 = arith.constant 0 : index
    %9 = vector.load %arg8[%c0_5, %c0_6, %c0_7] : memref<4x1x32xf32, #tpu.memory_space<vmem>>, vector<4x1x32xf32>
    %10 = vector.broadcast %9 : vector<4x1x32xf32> to vector<4x8x32xf32>
    %11 = arith.addf %8, %10 : vector<4x8x32xf32>
    %c0_8 = arith.constant 0 : index
    %c0_9 = arith.constant 0 : index
    %c0_10 = arith.constant 0 : index
    %12 = vector.load %arg6[%c0_8, %c0_9, %c0_10] : memref<4x128x32xbf16, #tpu.memory_space<vmem>>, vector<4x128x32xbf16>
    %cst_11 = arith.constant dense<0.000000e+00> : vector<4x8x32xf32>
    %13 = tpu.matmul %6, %12, %cst_11 {dimension_numbers = #tpu.dot_dimension_numbers<[2], [1], [1], [2], [0, 0, 0, 1, 1, 2], [0], [0]>} : vector<4x8x128xbf16>, vector<4x128x32xbf16>, vector<4x8x32xf32> -> vector<4x8x32xf32>
    %c0_12 = arith.constant 0 : index
    %c0_13 = arith.constant 0 : index
    %c0_14 = arith.constant 0 : index
    %14 = vector.load %arg9[%c0_12, %c0_13, %c0_14] : memref<4x1x32xf32, #tpu.memory_space<vmem>>, vector<4x1x32xf32>
    %15 = vector.broadcast %14 : vector<4x1x32xf32> to vector<4x8x32xf32>
    %16 = arith.addf %13, %15 : vector<4x8x32xf32>
    %c0_15 = arith.constant 0 : index
    %c0_16 = arith.constant 0 : index
    %c0_17 = arith.constant 0 : index
    %17 = vector.load %arg7[%c0_15, %c0_16, %c0_17] : memref<4x128x32xbf16, #tpu.memory_space<vmem>>, vector<4x128x32xbf16>
    %cst_18 = arith.constant dense<0.000000e+00> : vector<4x8x32xf32>
    %18 = tpu.matmul %6, %17, %cst_18 {dimension_numbers = #tpu.dot_dimension_numbers<[2], [1], [1], [2], [0, 0, 0, 1, 1, 2], [0], [0]>} : vector<4x8x128xbf16>, vector<4x128x32xbf16>, vector<4x8x32xf32> -> vector<4x8x32xf32>
    %c0_19 = arith.constant 0 : index
    %c0_20 = arith.constant 0 : index
    %c0_21 = arith.constant 0 : index
    %19 = vector.load %arg10[%c0_19, %c0_20, %c0_21] : memref<4x1x32xf32, #tpu.memory_space<vmem>>, vector<4x1x32xf32>
    %20 = vector.broadcast %19 : vector<4x1x32xf32> to vector<4x8x32xf32>
    %21 = arith.addf %18, %20 : vector<4x8x32xf32>
    %22 = arith.truncf %11 : vector<4x8x32xf32> to vector<4x8x32xbf16>
    %23 = arith.truncf %16 : vector<4x8x32xf32> to vector<4x8x32xbf16>
    %cst_22 = arith.constant dense<0.000000e+00> : vector<4x8x8xf32>
    %24 = tpu.matmul %22, %23, %cst_22 {dimension_numbers = #tpu.dot_dimension_numbers<[2], [2], [1], [1], [0, 0, 0, 1, 1, 1], [0], [0]>} : vector<4x8x32xbf16>, vector<4x8x32xbf16>, vector<4x8x8xf32> -> vector<4x8x8xf32>
    %cst_23 = arith.constant 0.176776692 : f32
    %25 = vector.broadcast %cst_23 : f32 to vector<4x8x8xf32>
    %26 = arith.mulf %24, %25 : vector<4x8x8xf32>
    %cst_24 = arith.constant dense<0xFF800000> : vector<4x8xf32>
    %27 = vector.multi_reduction <maximumf>, %26, %cst_24 [2] : vector<4x8x8xf32> to vector<4x8xf32>
    %28 = vector.shape_cast %27 : vector<4x8xf32> to vector<4x8x1xf32>
    %29 = vector.broadcast %28 : vector<4x8x1xf32> to vector<4x8x8xf32>
    %30 = arith.subf %26, %29 : vector<4x8x8xf32>
    %31 = math.exp %30 : vector<4x8x8xf32>
    %cst_25 = arith.constant dense<0.000000e+00> : vector<4x8xf32>
    %32 = vector.multi_reduction <add>, %31, %cst_25 [2] : vector<4x8x8xf32> to vector<4x8xf32>
    %33 = vector.shape_cast %32 : vector<4x8xf32> to vector<4x8x1xf32>
    %34 = tpu.reciprocal %33 {approx = true} : vector<4x8x1xf32> -> vector<4x8x1xf32>
    %35 = vector.broadcast %34 : vector<4x8x1xf32> to vector<4x8x8xf32>
    %36 = arith.mulf %31, %35 : vector<4x8x8xf32>
    %37 = arith.truncf %36 : vector<4x8x8xf32> to vector<4x8x8xbf16>
    %38 = arith.truncf %21 : vector<4x8x32xf32> to vector<4x8x32xbf16>
    %cst_26 = arith.constant dense<0.000000e+00> : vector<4x8x32xf32>
    %39 = tpu.matmul %37, %38, %cst_26 {dimension_numbers = #tpu.dot_dimension_numbers<[2], [1], [1], [2], [0, 0, 0, 1, 1, 2], [0], [0]>} : vector<4x8x8xbf16>, vector<4x8x32xbf16>, vector<4x8x32xf32> -> vector<4x8x32xf32>
    %40 = vector.extract_strided_slice %39 {offsets = [0, 0, 0], sizes = [1, 8, 32], strides = [1, 1, 1]} : vector<4x8x32xf32> to vector<1x8x32xf32>
    %41 = vector.shape_cast %40 : vector<1x8x32xf32> to vector<8x32xf32>
    %42 = vector.extract_strided_slice %39 {offsets = [1, 0, 0], sizes = [1, 8, 32], strides = [1, 1, 1]} : vector<4x8x32xf32> to vector<1x8x32xf32>
    %43 = vector.shape_cast %42 : vector<1x8x32xf32> to vector<8x32xf32>
    %44 = vector.extract_strided_slice %39 {offsets = [2, 0, 0], sizes = [1, 8, 32], strides = [1, 1, 1]} : vector<4x8x32xf32> to vector<1x8x32xf32>
    %45 = vector.shape_cast %44 : vector<1x8x32xf32> to vector<8x32xf32>
    %46 = vector.extract_strided_slice %39 {offsets = [3, 0, 0], sizes = [1, 8, 32], strides = [1, 1, 1]} : vector<4x8x32xf32> to vector<1x8x32xf32>
    %47 = vector.shape_cast %46 : vector<1x8x32xf32> to vector<8x32xf32>
    %48 = tpu.concatenate %41, %43, %45, %47 in 1 : vector<8x32xf32>, vector<8x32xf32>, vector<8x32xf32>, vector<8x32xf32> -> vector<8x128xf32>
    %49 = arith.truncf %48 : vector<8x128xf32> to vector<8x128xbf16>
    %c0_27 = arith.constant 0 : index
    %c0_28 = arith.constant 0 : index
    %50 = vector.load %arg11[%c0_27, %c0_28] : memref<128x128xbf16, #tpu.memory_space<vmem>>, vector<128x128xbf16>
    %cst_29 = arith.constant dense<0.000000e+00> : vector<8x128xf32>
    %51 = tpu.matmul %49, %50, %cst_29 {dimension_numbers = #tpu.dot_dimension_numbers<[1], [0], [0], [1], [0, 0, 1, 1], [], []>} : vector<8x128xbf16>, vector<128x128xbf16>, vector<8x128xf32> -> vector<8x128xf32>
    %c0_30 = arith.constant 0 : index
    %c0_31 = arith.constant 0 : index
    %52 = vector.load %arg12[%c0_30, %c0_31] : memref<1x128xf32, #tpu.memory_space<vmem>>, vector<1x128xf32>
    %53 = vector.broadcast %52 : vector<1x128xf32> to vector<8x128xf32>
    %54 = arith.addf %51, %53 : vector<8x128xf32>
    %55 = arith.addf %3, %54 : vector<8x128xf32>
    %c0_32 = arith.constant 0 : index
    %c0_33 = arith.constant 0 : index
    %c0_34 = arith.constant 0 : index
    %56 = vector.load %arg17[%c0_32, %c0_33, %c0_34] : memref<1x1x128xf32, #tpu.memory_space<vmem>>, vector<1x1x128xf32>
    %57 = vector.shape_cast %56 : vector<1x1x128xf32> to vector<1x128xf32>
    %c0_35 = arith.constant 0 : index
    %c0_36 = arith.constant 0 : index
    %c0_37 = arith.constant 0 : index
    %58 = vector.load %arg18[%c0_35, %c0_36, %c0_37] : memref<1x1x128xf32, #tpu.memory_space<vmem>>, vector<1x1x128xf32>
    %59 = vector.shape_cast %58 : vector<1x1x128xf32> to vector<1x128xf32>
    %cst_38 = arith.constant dense<0.000000e+00> : vector<8xf32>
    %60 = vector.multi_reduction <add>, %55, %cst_38 [1] : vector<8x128xf32> to vector<8xf32>
    %61 = vector.shape_cast %60 : vector<8xf32> to vector<8x1xf32>
    %cst_39 = arith.constant 1.280000e+02 : f32
    %62 = vector.broadcast %cst_39 : f32 to vector<8x1xf32>
    %63 = arith.divf %61, %62 : vector<8x1xf32>
    %64 = vector.broadcast %63 : vector<8x1xf32> to vector<8x128xf32>
    %65 = arith.subf %55, %64 : vector<8x128xf32>
    %66 = arith.mulf %65, %65 : vector<8x128xf32>
    %cst_40 = arith.constant dense<0.000000e+00> : vector<8xf32>
    %67 = vector.multi_reduction <add>, %66, %cst_40 [1] : vector<8x128xf32> to vector<8xf32>
    %68 = vector.shape_cast %67 : vector<8xf32> to vector<8x1xf32>
    %cst_41 = arith.constant 1.280000e+02 : f32
    %69 = vector.broadcast %cst_41 : f32 to vector<8x1xf32>
    %70 = arith.divf %68, %69 : vector<8x1xf32>
    %71 = vector.broadcast %63 : vector<8x1xf32> to vector<8x128xf32>
    %72 = arith.subf %55, %71 : vector<8x128xf32>
    %cst_42 = arith.constant 9.99999974E-6 : f32
    %73 = vector.broadcast %cst_42 : f32 to vector<8x1xf32>
    %74 = arith.addf %70, %73 : vector<8x1xf32>
    %75 = math.rsqrt %74 : vector<8x1xf32>
    %76 = vector.broadcast %75 : vector<8x1xf32> to vector<8x128xf32>
    %77 = arith.mulf %72, %76 : vector<8x128xf32>
    %78 = vector.broadcast %57 : vector<1x128xf32> to vector<8x128xf32>
    %79 = arith.mulf %77, %78 : vector<8x128xf32>
    %80 = vector.broadcast %59 : vector<1x128xf32> to vector<8x128xf32>
    %81 = arith.addf %79, %80 : vector<8x128xf32>
    %82 = arith.truncf %81 : vector<8x128xf32> to vector<8x128xbf16>
    %c0_43 = arith.constant 0 : index
    %c0_44 = arith.constant 0 : index
    %c0_45 = arith.constant 0 : index
    %83 = vector.load %arg13[%c0_43, %c0_44, %c0_45] : memref<1x128x256xbf16, #tpu.memory_space<vmem>>, vector<1x128x256xbf16>
    %84 = vector.shape_cast %83 : vector<1x128x256xbf16> to vector<128x256xbf16>
    %cst_46 = arith.constant dense<0.000000e+00> : vector<8x256xf32>
    %85 = tpu.matmul %82, %84, %cst_46 {dimension_numbers = #tpu.dot_dimension_numbers<[1], [0], [0], [1], [0, 0, 1, 1], [], []>} : vector<8x128xbf16>, vector<128x256xbf16>, vector<8x256xf32> -> vector<8x256xf32>
    %c0_47 = arith.constant 0 : index
    %c0_48 = arith.constant 0 : index
    %c0_49 = arith.constant 0 : index
    %86 = vector.load %arg14[%c0_47, %c0_48, %c0_49] : memref<1x1x256xf32, #tpu.memory_space<vmem>>, vector<1x1x256xf32>
    %87 = vector.shape_cast %86 : vector<1x1x256xf32> to vector<1x256xf32>
    %88 = vector.broadcast %87 : vector<1x256xf32> to vector<8x256xf32>
    %89 = arith.addf %85, %88 : vector<8x256xf32>
    %cst_50 = arith.constant 5.000000e-01 : f32
    %90 = vector.broadcast %cst_50 : f32 to vector<8x256xf32>
    %91 = arith.mulf %90, %89 : vector<8x256xf32>
    %cst_51 = arith.constant 0.707106769 : f32
    %92 = vector.broadcast %cst_51 : f32 to vector<8x256xf32>
    %93 = arith.mulf %89, %92 : vector<8x256xf32>
    %94 = math.erf %93 : vector<8x256xf32>
    %cst_52 = arith.constant 1.000000e+00 : f32
    %95 = vector.broadcast %cst_52 : f32 to vector<8x256xf32>
    %96 = arith.addf %95, %94 : vector<8x256xf32>
    %97 = arith.mulf %91, %96 : vector<8x256xf32>
    %98 = arith.truncf %97 : vector<8x256xf32> to vector<8x256xbf16>
    %c0_53 = arith.constant 0 : index
    %c0_54 = arith.constant 0 : index
    %c0_55 = arith.constant 0 : index
    %99 = vector.load %arg15[%c0_53, %c0_54, %c0_55] : memref<1x256x128xbf16, #tpu.memory_space<vmem>>, vector<1x256x128xbf16>
    %100 = vector.shape_cast %99 : vector<1x256x128xbf16> to vector<256x128xbf16>
    %cst_56 = arith.constant dense<0.000000e+00> : vector<8x128xf32>
    %101 = tpu.matmul %98, %100, %cst_56 {dimension_numbers = #tpu.dot_dimension_numbers<[1], [0], [0], [1], [0, 0, 1, 1], [], []>} : vector<8x256xbf16>, vector<256x128xbf16>, vector<8x128xf32> -> vector<8x128xf32>
    %c0_57 = arith.constant 0 : index
    %c0_58 = arith.constant 0 : index
    %c0_59 = arith.constant 0 : index
    %102 = vector.load %arg16[%c0_57, %c0_58, %c0_59] : memref<1x1x128xf32, #tpu.memory_space<vmem>>, vector<1x1x128xf32>
    %103 = vector.shape_cast %102 : vector<1x1x128xf32> to vector<1x128xf32>
    %104 = vector.broadcast %103 : vector<1x128xf32> to vector<8x128xf32>
    %105 = arith.addf %101, %104 : vector<8x128xf32>
    %106 = arith.addf %81, %105 : vector<8x128xf32>
    %c0_60 = arith.constant 0 : index
    %c0_61 = arith.constant 0 : index
    %c0_62 = arith.constant 0 : index
    %107 = vector.load %arg19[%c0_60, %c0_61, %c0_62] : memref<1x1x128xf32, #tpu.memory_space<vmem>>, vector<1x1x128xf32>
    %108 = vector.shape_cast %107 : vector<1x1x128xf32> to vector<1x128xf32>
    %c0_63 = arith.constant 0 : index
    %c0_64 = arith.constant 0 : index
    %c0_65 = arith.constant 0 : index
    %109 = vector.load %arg20[%c0_63, %c0_64, %c0_65] : memref<1x1x128xf32, #tpu.memory_space<vmem>>, vector<1x1x128xf32>
    %110 = vector.shape_cast %109 : vector<1x1x128xf32> to vector<1x128xf32>
    %cst_66 = arith.constant dense<0.000000e+00> : vector<8xf32>
    %111 = vector.multi_reduction <add>, %106, %cst_66 [1] : vector<8x128xf32> to vector<8xf32>
    %112 = vector.shape_cast %111 : vector<8xf32> to vector<8x1xf32>
    %cst_67 = arith.constant 1.280000e+02 : f32
    %113 = vector.broadcast %cst_67 : f32 to vector<8x1xf32>
    %114 = arith.divf %112, %113 : vector<8x1xf32>
    %115 = vector.broadcast %114 : vector<8x1xf32> to vector<8x128xf32>
    %116 = arith.subf %106, %115 : vector<8x128xf32>
    %117 = arith.mulf %116, %116 : vector<8x128xf32>
    %cst_68 = arith.constant dense<0.000000e+00> : vector<8xf32>
    %118 = vector.multi_reduction <add>, %117, %cst_68 [1] : vector<8x128xf32> to vector<8xf32>
    %119 = vector.shape_cast %118 : vector<8xf32> to vector<8x1xf32>
    %cst_69 = arith.constant 1.280000e+02 : f32
    %120 = vector.broadcast %cst_69 : f32 to vector<8x1xf32>
    %121 = arith.divf %119, %120 : vector<8x1xf32>
    %122 = vector.broadcast %114 : vector<8x1xf32> to vector<8x128xf32>
    %123 = arith.subf %106, %122 : vector<8x128xf32>
    %cst_70 = arith.constant 9.99999974E-6 : f32
    %124 = vector.broadcast %cst_70 : f32 to vector<8x1xf32>
    %125 = arith.addf %121, %124 : vector<8x1xf32>
    %126 = math.rsqrt %125 : vector<8x1xf32>
    %127 = vector.broadcast %126 : vector<8x1xf32> to vector<8x128xf32>
    %128 = arith.mulf %123, %127 : vector<8x128xf32>
    %129 = vector.broadcast %108 : vector<1x128xf32> to vector<8x128xf32>
    %130 = arith.mulf %128, %129 : vector<8x128xf32>
    %131 = vector.broadcast %110 : vector<1x128xf32> to vector<8x128xf32>
    %132 = arith.addf %130, %131 : vector<8x128xf32>
    %c0_71 = arith.constant 0 : index
    %c0_72 = arith.constant 0 : index
    %133 = vector.load %arg24[%c0_71, %c0_72] : memref<8x128xf32, #tpu.memory_space<vmem>>, vector<8x128xf32>
    tpu.vector_store %arg24[%c0_71, %c0_72], %132 {strides = array<i32>} : memref<8x128xf32, #tpu.memory_space<vmem>>, vector<8x128xf32>,
    %c1_i32 = arith.constant 1 : i32
    %134 = arith.cmpi eq, %arg1, %c1_i32 : i32
    %135 = arith.extui %134 : i1 to i32
    %c0_i32_73 = arith.constant 0 : i32
    %136 = arith.cmpi ne, %135, %c0_i32_73 : i32
    scf.if %136 {
      %c0_74 = arith.constant 0 : index
      %c0_75 = arith.constant 0 : index
      %137 = vector.load %arg21[%c0_74, %c0_75] : memref<1x128xf32, #tpu.memory_space<vmem>>, vector<1x128xf32>
      %cst_76 = arith.constant dense<0.000000e+00> : vector<1x8xf32>
      %138 = tpu.matmul %137, %132, %cst_76 {dimension_numbers = #tpu.dot_dimension_numbers<[1], [1], [0], [0], [0, 0, 1, 0], [], []>} : vector<1x128xf32>, vector<8x128xf32>, vector<1x8xf32> -> vector<1x8xf32>
      %c0_77 = arith.constant 0 : index
      %c0_78 = arith.constant 0 : index
      %139 = memref.load %arg22[%c0_77, %c0_78] : memref<1x1xf32, #tpu.memory_space<smem>>
      %140 = vector.broadcast %139 : f32 to vector<1x8xf32>
      %141 = arith.addf %138, %140 : vector<1x8xf32>
      %142 = vector.shape_cast %141 : vector<1x8xf32> to vector<1x1x8xf32>
      %c0_79 = arith.constant 0 : index
      %c0_80 = arith.constant 0 : index
      %c0_81 = arith.constant 0 : index
      %143 = vector.load %arg23[%c0_79, %c0_80, %c0_81] : memref<1x1x8xf32, #tpu.memory_space<vmem>>, vector<1x1x8xf32>
      tpu.vector_store %arg23[%c0_79, %c0_80, %c0_81], %142 {strides = array<i32>} : memref<1x1x8xf32, #tpu.memory_space<vmem>>, vector<1x1x8xf32>,
    } else {
    }
    return
  }
  func.func @transform_0(%arg0: i32, %arg1: i32) -> (i32, i32, i32) {
    %c0_i32 = arith.constant 0 : i32
    %c0_i32_0 = arith.constant 0 : i32
    %c0_i32_1 = arith.constant 0 : i32
    return %arg0, %c0_i32, %c0_i32_0 : i32, i32, i32
  }
  func.func @transform_1(%arg0: i32, %arg1: i32) -> (i32, i32) {
    %c0_i32 = arith.constant 0 : i32
    %c0_i32_0 = arith.constant 0 : i32
    %c0_i32_1 = arith.constant 0 : i32
    return %c0_i32, %c0_i32_0 : i32, i32
  }
  func.func @transform_2(%arg0: i32, %arg1: i32) -> (i32, i32) {
    %c0_i32 = arith.constant 0 : i32
    %c0_i32_0 = arith.constant 0 : i32
    %c0_i32_1 = arith.constant 0 : i32
    return %c0_i32, %c0_i32_0 : i32, i32
  }
  func.func @transform_3(%arg0: i32, %arg1: i32) -> (i32, i32, i32) {
    %c0_i32 = arith.constant 0 : i32
    %c0_i32_0 = arith.constant 0 : i32
    %c0_i32_1 = arith.constant 0 : i32
    %c0_i32_2 = arith.constant 0 : i32
    return %c0_i32, %c0_i32_0, %c0_i32_1 : i32, i32, i32
  }
  func.func @transform_4(%arg0: i32, %arg1: i32) -> (i32, i32, i32) {
    %c0_i32 = arith.constant 0 : i32
    %c0_i32_0 = arith.constant 0 : i32
    %c0_i32_1 = arith.constant 0 : i32
    %c0_i32_2 = arith.constant 0 : i32
    return %c0_i32, %c0_i32_0, %c0_i32_1 : i32, i32, i32
  }
  func.func @transform_5(%arg0: i32, %arg1: i32) -> (i32, i32, i32) {
    %c0_i32 = arith.constant 0 : i32
    %c0_i32_0 = arith.constant 0 : i32
    %c0_i32_1 = arith.constant 0 : i32
    %c0_i32_2 = arith.constant 0 : i32
    return %c0_i32, %c0_i32_0, %c0_i32_1 : i32, i32, i32
  }
  func.func @transform_6(%arg0: i32, %arg1: i32) -> (i32, i32, i32) {
    %c0_i32 = arith.constant 0 : i32
    %c0_i32_0 = arith.constant 0 : i32
    %c0_i32_1 = arith.constant 0 : i32
    %c0_i32_2 = arith.constant 0 : i32
    return %c0_i32, %c0_i32_0, %c0_i32_1 : i32, i32, i32
  }
  func.func @transform_7(%arg0: i32, %arg1: i32) -> (i32, i32, i32) {
    %c0_i32 = arith.constant 0 : i32
    %c0_i32_0 = arith.constant 0 : i32
    %c0_i32_1 = arith.constant 0 : i32
    %c0_i32_2 = arith.constant 0 : i32
    return %c0_i32, %c0_i32_0, %c0_i32_1 : i32, i32, i32
  }
  func.func @transform_8(%arg0: i32, %arg1: i32) -> (i32, i32, i32) {
    %c0_i32 = arith.constant 0 : i32
    %c0_i32_0 = arith.constant 0 : i32
    %c0_i32_1 = arith.constant 0 : i32
    %c0_i32_2 = arith.constant 0 : i32
    return %c0_i32, %c0_i32_0, %c0_i32_1 : i32, i32, i32
  }
  func.func @transform_9(%arg0: i32, %arg1: i32) -> (i32, i32) {
    %c0_i32 = arith.constant 0 : i32
    %c0_i32_0 = arith.constant 0 : i32
    %c0_i32_1 = arith.constant 0 : i32
    return %c0_i32, %c0_i32_0 : i32, i32
  }
  func.func @transform_10(%arg0: i32, %arg1: i32) -> (i32, i32) {
    %c0_i32 = arith.constant 0 : i32
    %c0_i32_0 = arith.constant 0 : i32
    %c0_i32_1 = arith.constant 0 : i32
    return %c0_i32, %c0_i32_0 : i32, i32
  }
  func.func @transform_11(%arg0: i32, %arg1: i32) -> (i32, i32, i32) {
    %c0_i32 = arith.constant 0 : i32
    %c0_i32_0 = arith.constant 0 : i32
    %c0_i32_1 = arith.constant 0 : i32
    return %arg1, %c0_i32, %c0_i32_0 : i32, i32, i32
  }
  func.func @transform_12(%arg0: i32, %arg1: i32) -> (i32, i32, i32) {
    %c0_i32 = arith.constant 0 : i32
    %c0_i32_0 = arith.constant 0 : i32
    %c0_i32_1 = arith.constant 0 : i32
    return %arg1, %c0_i32, %c0_i32_0 : i32, i32, i32
  }
  func.func @transform_13(%arg0: i32, %arg1: i32) -> (i32, i32, i32) {
    %c0_i32 = arith.constant 0 : i32
    %c0_i32_0 = arith.constant 0 : i32
    %c0_i32_1 = arith.constant 0 : i32
    return %arg1, %c0_i32, %c0_i32_0 : i32, i32, i32
  }
  func.func @transform_14(%arg0: i32, %arg1: i32) -> (i32, i32, i32) {
    %c0_i32 = arith.constant 0 : i32
    %c0_i32_0 = arith.constant 0 : i32
    %c0_i32_1 = arith.constant 0 : i32
    return %arg1, %c0_i32, %c0_i32_0 : i32, i32, i32
  }
  func.func @transform_15(%arg0: i32, %arg1: i32) -> (i32, i32, i32) {
    %c0_i32 = arith.constant 0 : i32
    %c0_i32_0 = arith.constant 0 : i32
    %c0_i32_1 = arith.constant 0 : i32
    return %arg1, %c0_i32, %c0_i32_0 : i32, i32, i32
  }
  func.func @transform_16(%arg0: i32, %arg1: i32) -> (i32, i32, i32) {
    %c0_i32 = arith.constant 0 : i32
    %c0_i32_0 = arith.constant 0 : i32
    %c0_i32_1 = arith.constant 0 : i32
    return %arg1, %c0_i32, %c0_i32_0 : i32, i32, i32
  }
  func.func @transform_17(%arg0: i32, %arg1: i32) -> (i32, i32, i32) {
    %c0_i32 = arith.constant 0 : i32
    %c0_i32_0 = arith.constant 0 : i32
    %c0_i32_1 = arith.constant 0 : i32
    return %arg1, %c0_i32, %c0_i32_0 : i32, i32, i32
  }
  func.func @transform_18(%arg0: i32, %arg1: i32) -> (i32, i32, i32) {
    %c0_i32 = arith.constant 0 : i32
    %c0_i32_0 = arith.constant 0 : i32
    %c0_i32_1 = arith.constant 0 : i32
    return %arg1, %c0_i32, %c0_i32_0 : i32, i32, i32
  }
  func.func @transform_19(%arg0: i32, %arg1: i32) -> (i32, i32) {
    %c0_i32 = arith.constant 0 : i32
    %c0_i32_0 = arith.constant 0 : i32
    %c0_i32_1 = arith.constant 0 : i32
    return %c0_i32, %c0_i32_0 : i32, i32
  }
  func.func @transform_20(%arg0: i32, %arg1: i32) -> (i32, i32) {
    %c0_i32 = arith.constant 0 : i32
    %c0_i32_0 = arith.constant 0 : i32
    %c0_i32_1 = arith.constant 0 : i32
    return %c0_i32, %c0_i32_0 : i32, i32
  }
  func.func @transform_21(%arg0: i32, %arg1: i32) -> (i32, i32, i32) {
    %c0_i32 = arith.constant 0 : i32
    %c0_i32_0 = arith.constant 0 : i32
    %c0_i32_1 = arith.constant 0 : i32
    return %arg0, %c0_i32, %c0_i32_0 : i32, i32, i32
  }
}

</mosaic_0001>

<bundles_post_ra>
// kernel: little_bert_forward.1
= control target key start
LH: loop header
LB: loop body
LE: loop exit
PB: predicated region body
PF: predicated region fallthrough
CT: control target
= control target key end

     0   :  { %s4541_s0 = inlined_call_operand.vmem [shape: bf16[2,8,64], index: 0, kind: input, shape index: {}]   ;;  %s4542_s1 = inlined_call_operand.vmem [shape: bf16[64,128], index: 1, kind: input, shape index: {}]   ;;  %s4543_s2 = inlined_call_operand.vmem [shape: f32[1,128], index: 2, kind: input, shape index: {}]   ;;  %s4544_s3 = inlined_call_operand.vmem [shape: bf16[4,128,32], index: 3, kind: input, shape index: {}]   ;;  %s4545_s4 = inlined_call_operand.vmem [shape: bf16[4,128,32], index: 4, kind: input, shape index: {}]   ;;  %s4546_s5 = inlined_call_operand.vmem [shape: bf16[4,128,32], index: 5, kind: input, shape index: {}]   ;;  %s4547_s6 = inlined_call_operand.vmem [shape: f32[4,1,32], index: 6, kind: input, shape index: {}]   ;;  %s4548_s7 = inlined_call_operand.vmem [shape: f32[4,1,32], index: 7, kind: input, shape index: {}]   ;;  %s4549_s8 = inlined_call_operand.vmem [shape: f32[4,1,32], index: 8, kind: input, shape index: {}]   ;;  %s4550_s9 = inlined_call_operand.vmem [shape: bf16[128,128], index: 9, kind: input, shape index: {}]   ;;  %s4551_s10 = inlined_call_operand.vmem [shape: f32[1,128], index: 10, kind: input, shape index: {}]   ;;  %s4552_s11 = inlined_call_operand.vmem [shape: bf16[2,128,256], index: 11, kind: input, shape index: {}]   ;;  %s4553_s12 = inlined_call_operand.vmem [shape: f32[2,1,256], index: 12, kind: input, shape index: {}]   ;;  %s4554_s13 = inlined_call_operand.vmem [shape: bf16[2,256,128], index: 13, kind: input, shape index: {}]   ;;  %s4555_s14 = inlined_call_operand.vmem [shape: f32[2,1,128], index: 14, kind: input, shape index: {}]   ;;  %s4556_s15 = inlined_call_operand.vmem [shape: f32[2,1,128], index: 15, kind: input, shape index: {}]   ;;  %s4557_s16 = inlined_call_operand.vmem [shape: f32[2,1,128], index: 16, kind: input, shape index: {}]   ;;  %s4558_s17 = inlined_call_operand.vmem [shape: f32[2,1,128], index: 17, kind: input, shape index: {}]   ;;  %s4559_s18 = inlined_call_operand.vmem [shape: f32[2,1,128], index: 18, kind: input, shape index: {}]   ;;  %s4560_s19 = inlined_call_operand.vmem [shape: f32[1,128], index: 19, kind: input, shape index: {}]   ;;  %s4561_s20 = inlined_call_operand.<no memory space> [shape: f32[1,1], index: 20, kind: input, shape index: {}]   ;;  %s4562_s21 = inlined_call_operand.hbm [shape: f32[2,1,8], index: 21, kind: output, shape index: {}]  }
   0x1   :  { %4581 = sst [smem:[#allocation19_spill]] %s4541_s0 }
   0x2   :  { %4582 = sst [smem:[#allocation20_spill]] %s4542_s1 }
   0x3   :  { %4583 = sst [smem:[#allocation21_spill]] %s4543_s2 }
   0x4   :  { %4584 = sst [smem:[#allocation22_spill]] %s4544_s3 }
   0x5   :  { %4585 = sst [smem:[#allocation23_spill]] %s4545_s4 }
   0x6   :  { %4586 = sst [smem:[#allocation24_spill]] %s4546_s5 }
   0x7   :  { %4587 = sst [smem:[#allocation25_spill]] %s4550_s9 }
   0x8   :  { %4588 = sst [smem:[#allocation26_spill]] %s4551_s10 }
   0x9   :  { %4589 = sst [smem:[#allocation27_spill]] %s4552_s11 }
   0xa   :  { %4590 = sst [smem:[#allocation28_spill]] %s4553_s12 }
   0xb   :  { %4591 = sst [smem:[#allocation29_spill]] %s4554_s13 }
   0xc   :  { %4592 = sst [smem:[#allocation30_spill]] %s4560_s19 }
   0xd   :  { %4593 = sst [smem:[#allocation31_spill]] %s4562_s21 }
   0xe   :  { %26 = sst [smem:[#allocation3]] %s4561_s20 }
   0xf   :  { %27 = vsyncpa [#allocation5], 0 }
  0x10   :  { %29 = vsyncpa [#allocation5 + $0x1], 0  ;;  %s3840_s26 = smov 0   ;;  %s3842_s27 = smov 0  }
  0x11   :  { %s3844_s3 = smov 0   ;;  %s3846_s28 = smov 0  }
  0x12   :  { %s3848_s29 = smov 0   ;;  %s3850_s0 = smov 0  }
  0x13   :  { %s3852_s4 = smov 0   ;;  %s3854_s30 = smov 0  }
  0x14 LB: > { %4594 = sst [smem:[#allocation7_spill]] %s3693_s26  ;;  %s2779_s20 = sadd.s32 4294967295, %s3721_s30   ;;  %s3721_s30 = sphi %s3854_s30, %s35_s30   ;;  %s3717_s4 = sphi %s3852_s4, %s4638_s4   ;;  %s3713_s0 = sphi %s3850_s0, %s4637_s0   ;;  %s3709_s29 = sphi %s3848_s29, %s4636_s29   ;;  %s3705_s28 = sphi %s3846_s28, %s4635_s28   ;;  %s3701_s3 = sphi %s3844_s3, %s4634_s3   ;;  %s3697_s27 = sphi %s3842_s27, %s4640_s27   ;;  %s3693_s26 = sphi %s3840_s26, %s4639_s26  }
  0x15   : > { %4595 = sst [smem:[#allocation8_spill]] %s3701_s3  ;;  %s2780_s5 = sadd.s32 4294967294, %s3721_s30  }
  0x16   : > { %4596 = sst [smem:[#allocation9_spill]] %s3709_s29  ;;  %s44_s22 = sadd.s32 1, %s3713_s0 }
  0x17   : > { %4597 = sst [smem:[#allocation10_spill]] %s3713_s0  ;;  %p45_p0 = scmp.ge.s32.totalorder %s44_s22, 2 }
  0x18   : > { %4598 = sst [smem:[#allocation11_spill]] %s3717_s4  ;;  %s47_s23 = sadd.s32 1, %s3717_s4 }
  0x19   : > { %4599 = sst [smem:[#allocation12_spill]] %s3721_s30  ;;  %p550_p1 = scmp.ne.s32.totalorder %s3701_s3, %s3697_s27 }
  0x1a   : > { %p551_p2 = scmp.eq.s32.totalorder %s2779_s20, 3  ;;  %s4642_s22 = smov (%p45_p0, %s44_s22), 0 }
  0x1b   : > { %4600 = sst [smem:[#allocation13_spill]] %s4642_s22  ;;  %s4644_s23 = smov (!%p45_p0, %s47_s23), %s3717_s4 }
  0x1c   : > { %p3889_p3 = por %p551_p2, %p550_p1  ;;  %p556_p4 = scmp.ne.s32.totalorder %s3697_s27, %s3693_s26 }
  0x1d   : > { %p49_p5 = scmp.ge.s32.totalorder %s4644_s23, 2  ;;  %p557_p6 = scmp.eq.s32.totalorder %s2780_s5, 3 }
  0x1e   : > { %s4601_s1 = scalar_select %p3889_p3, 1, 0 }
  0x1f   : > { %p2783_p7 = scmp.ge.s32.totalorder %s3721_s30, 1  ;;  %p671_p8 = scmp.lt.s32.totalorder %s3721_s30, 5 }
  0x20   : > { %4602 = sst [smem:[#allocation14_spill]] %s4601_s1  ;;  %s4646_s23 = smov (%p49_p5, %s4644_s23), 0 }
  0x21   : > { %4603 = sst [smem:[#allocation15_spill]] %s4646_s23  ;;  %p3899_p9 = por %p557_p6, %p556_p4 }
  0x22   : > { %p672_p10 = pnand %p2783_p7, %p671_p8  ;;  %s537_s2 = ssub.s32 %s3717_s4, %s4646_s23 }
  0x23   : > { %s4604_s24 = scalar_select %p3899_p9, 1, 0 }
  0x24   : > { %s540_s25 = sadd.s32 1, %s3701_s3  ;;  %p538_p11 = scmp.eq.s32.totalorder %s537_s2, 0 }
  0x25   : > { %4605 = sst [smem:[#allocation16_spill]] %s4604_s24  ;;  %675 = sbr.rel (%p672_p10) target bundleno = 2207 (0x89f), region = 104 }
  0x26   : > { %s3907_s20 = scalar_select %p538_p11, %s3701_s3, %s540_s25  }
  0x28   : > { %4606 = sst [smem:[#allocation17_spill]] %s3907_s20 }
  0x2a   : > { %p758_p12 = scmp.lt.s32.totalorder %s3709_s29, 1  ;;  %p762_p13 = scmp.lt.s32.totalorder %s3705_s28, 1 }
  0x2b   : > { %s4607_s4 = sld [smem:[#allocation19_spill]]  ;;  %p2790_p0 = scmp.ne.s32.totalorder %s3705_s28, 0 }
  0x2c   : > { %s759_s22 = scalar_select %p758_p12, %s3709_s29, 1 }
  0x2d   : > { %s3914_s0 = scalar_select %p762_p13, %s3705_s28, 1 }
  0x2e   : > { %s2784_s2 = sshll.u32 %s759_s22, 2  ;;  %s4608_s11 = sld [smem:[#allocation27_spill]] }
  0x2f   : > { %s3365_s3 = sshll.u32 %s3914_s0, 7  ;;  %s2787_s30 = sshll.u32 %s3914_s0, 1 }
  0x30   : > { %s4610_s12 = sld [smem:[#allocation28_spill]]  ;;  %s781_s24 = scalar_lea.vmem %s4556_s15, %s3914_s0 }
  0x31   : > { %s761_s20 = scalar_lea.vmem %s4607_s4, %s2784_s2  ;;  %s4611_s13 = sld [smem:[#allocation29_spill]] }
  0x32   : > { %s4613_s2 = sld [smem:[#allocation20_spill]] (!%p2790_p0) }
  0x33   : > { %s4614_s9 = sld [smem:[#allocation21_spill]] (!%p2790_p0) }
  0x34   : > { %s3923_s26 = scalar_lea.vmem %s4608_s11, %s3365_s3  ;;  %795 = sbr.rel (%p2790_p0) target bundleno = 207 (0xcf), region = 108 }
  0x35   : > { %4609 = sst [smem:[#allocation18_spill]] %s3923_s26  ;;  %s784_s26 = scalar_lea.vmem %s4557_s16, %s3914_s0 }
  0x36   : > { %s3929_s29 = scalar_lea.vmem %s4610_s12, %s2787_s30 }
  0x37   : > { %s3934_s22 = scalar_lea.vmem %s4611_s13, %s3365_s3  ;;  %s4612_s3 = sand.u32 1, %s3697_s27  }
  0x38   : > { %s3958_s13 = scalar_lea.vmem [#allocation4], %s4612_s3 }
  0x39   : > { %v3370_v0 = vld [vmem:[%s4613_s2 + $0x18] sm:$0xff]  ;;  %v3369_v1 = vld [vmem:[%s4613_s2 + $0x10] sm:$0xff]  ;;  %v3368_v2 = vld [vmem:[%s4613_s2 + $0x8] sm:$0xff]  ;;  %vm833_vm0 = vcmask 523264  }
  0x3a   : > { %841 = vmatpush.bf16.msra.mxu0 %v3370_v0  ;;  %v3367_v3 = vld [vmem:[%s4613_s2] sm:$0xff] }
  0x3b   : > { %v796_v4 = vld [vmem:[%s761_s20] sm:$0xf] }
  0x3c   : > { %v3582_v5 = vld [vmem:[%s4614_s9] ss:$0 sm:$0xff] }
  0x3e   : > { %842 = vmatpush.bf16.msra.mxu0 %v3369_v1 }
  0x42   : > { %843 = vmatpush.bf16.msra.mxu0 %v3368_v2 }
  0x46   : > { %844 = vmatpush.bf16.msra.mxu0 %v3367_v3 }
  0x49   : > { %2807 = vmatmul.msk.bf16.vlgmr.msra.gmra.mxu0 %vm833_vm0, %v796_v4 }
  0xc6   : > { %v846_v6 = vpop.f32.mrf.mxu0 }
  0xc7   : > { %v847_v7 = vadd.f32 %v3582_v5, %v846_v6 }
  0xc9   : > { %850 = vst [vmem:[#allocation2] sm:$0xff] %v847_v7 }
  0xce   : > { %v848_v8 = vpop.f32.mrf.mxu0 }
  0xcf PF: > { %s4615_s25 = sld [smem:[#allocation22_spill]]  ;;  %vm1833_vm1 = vcmask 261120   ;;  %vm1970_vm2 = vcmask 1043456   ;;  %vm1914_vm3 = vcmask 64512   ;;  %s3723_s30 = smov 32   ;;  %vm2057_vm4 = vcmask 523264  }
  0xd0   : > { %v4063_v38 = vld [vmem:[#allocation2] sm:$0xff]  ;;  %s4616_s5 = sld [smem:[#allocation23_spill]]  ;;  %s3724_s10 = smov 64   ;;  %vm2059_vm5 = vcmask 785408  }
  0xd1   : > { %v4079_v43 = vpack.c.bf16 %v4063_v38, %v4063_v38  ;;  %s4617_s1 = sld [smem:[#allocation24_spill]]  ;;  %s3725_s3 = smov 96  }
  0xd2   : > { %s4618_s23 = sld [smem:[#allocation25_spill]]  ;;  %s4622_s12 = scalar_lea.vmem %s4558_s17, %s3914_s0 }
  0xd3   : > { %s4619_s4 = sld [smem:[#allocation18_spill]]  ;;  %p3362_p1 = scmp.ne.s32.totalorder %s3705_s28, 1 }
  0xd4   : > { %s4624_s19 = sld [smem:[#allocation30_spill]] (!%p3362_p1) }
  0xd5   : > { %v3378_v9 = vld [vmem:[%s4615_s25 + $0x38] sm:$0xff]  ;;  %v3377_v12 = vld [vmem:[%s4615_s25 + $0x30] sm:$0xff]  ;;  %v3376_v16 = vld [vmem:[%s4615_s25 + $0x28] sm:$0xff]  ;;  %s2595_s11 = sld [smem:[#allocation3]] (!%p3362_p1) }
  0xd6   : > { %v3394_v10 = vld [vmem:[%s4615_s25 + $0xb8] sm:$0xff]  ;;  %981 = vmatpush.bf16.msra.mxu0 %v3378_v9  ;;  %v3393_v13 = vld [vmem:[%s4615_s25 + $0xb0] sm:$0xff]  ;;  %v3392_v17 = vld [vmem:[%s4615_s25 + $0xa8] sm:$0xff] }
  0xd7   : > { %v3402_v11 = vld [vmem:[%s4615_s25 + $0xf8] sm:$0xff]  ;;  %1103 = vmatpush.bf16.msra.mxu2 %v3394_v10  ;;  %v3401_v14 = vld [vmem:[%s4615_s25 + $0xf0] sm:$0xff]  ;;  %v3400_v18 = vld [vmem:[%s4615_s25 + $0xe8] sm:$0xff] }
  0xd8   : > { %1164 = vmatpush.bf16.msra.mxu3 %v3402_v11  ;;  %v3386_v15 = vld [vmem:[%s4615_s25 + $0x78] sm:$0xff]  ;;  %v3385_v19 = vld [vmem:[%s4615_s25 + $0x70] sm:$0xff]  ;;  %v3375_v20 = vld [vmem:[%s4615_s25 + $0x20] sm:$0xff] }
  0xd9   : > { %1042 = vmatpush.bf16.msra.mxu1 %v3386_v15  ;;  %v3391_v21 = vld [vmem:[%s4615_s25 + $0xa0] sm:$0xff]  ;;  %v3384_v23 = vld [vmem:[%s4615_s25 + $0x68] sm:$0xff]  ;;  %v3374_v24 = vld [vmem:[%s4615_s25 + $0x18] sm:$0xff] }
  0xda   : > { %982 = vmatpush.bf16.msra.mxu0 %v3377_v12  ;;  %v3399_v22 = vld [vmem:[%s4615_s25 + $0xe0] sm:$0xff]  ;;  %v3390_v25 = vld [vmem:[%s4615_s25 + $0x98] sm:$0xff]  ;;  %v3373_v28 = vld [vmem:[%s4615_s25 + $0x10] sm:$0xff] }
  0xdb   : > { %1104 = vmatpush.bf16.msra.mxu2 %v3393_v13  ;;  %v3398_v26 = vld [vmem:[%s4615_s25 + $0xd8] sm:$0xff]  ;;  %v3383_v27 = vld [vmem:[%s4615_s25 + $0x60] sm:$0xff]  ;;  %v3389_v29 = vld [vmem:[%s4615_s25 + $0x90] sm:$0xff] }
  0xdc   : > { %1165 = vmatpush.bf16.msra.mxu3 %v3401_v14  ;;  %v3397_v30 = vld [vmem:[%s4615_s25 + $0xd0] sm:$0xff]  ;;  %v3382_v31 = vld [vmem:[%s4615_s25 + $0x58] sm:$0xff]  ;;  %v3372_v32 = vld [vmem:[%s4615_s25 + $0x8] sm:$0xff] }
  0xdd   : > { %1043 = vmatpush.bf16.msra.mxu1 %v3385_v19  ;;  %v3388_v33 = vld [vmem:[%s4615_s25 + $0x88] sm:$0xff]  ;;  %v3381_v35 = vld [vmem:[%s4615_s25 + $0x50] sm:$0xff]  ;;  %v3371_v36 = vld [vmem:[%s4615_s25] sm:$0xff] }
  0xde   : > { %983 = vmatpush.bf16.msra.mxu0 %v3376_v16  ;;  %v3396_v34 = vld [vmem:[%s4615_s25 + $0xc8] sm:$0xff]  ;;  %v3387_v37 = vld [vmem:[%s4615_s25 + $0x80] sm:$0xff]  ;;  %v3410_v40 = vld [vmem:[%s4616_s5 + $0x38] sm:$0xff] }
  0xdf   : > { %1105 = vmatpush.bf16.msra.mxu2 %v3392_v17  ;;  %v3395_v39 = vld [vmem:[%s4615_s25 + $0xc0] sm:$0xff]  ;;  %v3426_v41 = vld [vmem:[%s4616_s5 + $0xb8] sm:$0xff]  ;;  %v3380_v44 = vld [vmem:[%s4615_s25 + $0x48] sm:$0xff] }
  0xe0   : > { %1166 = vmatpush.bf16.msra.mxu3 %v3400_v18  ;;  %v3434_v42 = vld [vmem:[%s4616_s5 + $0xf8] sm:$0xff]  ;;  %v3409_v45 = vld [vmem:[%s4616_s5 + $0x30] sm:$0xff]  ;;  %v3379_v48 = vld [vmem:[%s4615_s25 + $0x40] sm:$0xff] }
  0xe1   : > { %1044 = vmatpush.bf16.msra.mxu1 %v3384_v23  ;;  %v3425_v46 = vld [vmem:[%s4616_s5 + $0xb0] sm:$0xff]  ;;  %v3418_v49 = vld [vmem:[%s4616_s5 + $0x78] sm:$0xff]  ;;  %v3408_v50 = vld [vmem:[%s4616_s5 + $0x28] sm:$0xff] }
  0xe2   : > { %984 = vmatpush.bf16.msra.mxu0 %v3375_v20  ;;  %v3433_v47 = vld [vmem:[%s4616_s5 + $0xf0] sm:$0xff]  ;;  %v3424_v51 = vld [vmem:[%s4616_s5 + $0xa8] sm:$0xff]  ;;  %v3407_v54 = vld [vmem:[%s4616_s5 + $0x20] sm:$0xff] }
  0xe3   : > { %1106 = vmatpush.bf16.msra.mxu2 %v3391_v21  ;;  %v3432_v52 = vld [vmem:[%s4616_s5 + $0xe8] sm:$0xff]  ;;  %v3417_v53 = vld [vmem:[%s4616_s5 + $0x70] sm:$0xff]  ;;  %v3423_v55 = vld [vmem:[%s4616_s5 + $0xa0] sm:$0xff] }
  0xe4   : > { %1167 = vmatpush.bf16.msra.mxu3 %v3399_v22  ;;  %v3431_v56 = vld [vmem:[%s4616_s5 + $0xe0] sm:$0xff]  ;;  %v3416_v57 = vld [vmem:[%s4616_s5 + $0x68] sm:$0xff]  ;;  %v3406_v58 = vld [vmem:[%s4616_s5 + $0x18] sm:$0xff] }
  0xe5   : > { %1045 = vmatpush.bf16.msra.mxu1 %v3383_v27  ;;  %v3422_v59 = vld [vmem:[%s4616_s5 + $0x98] sm:$0xff]  ;;  %v3415_v61 = vld [vmem:[%s4616_s5 + $0x60] sm:$0xff]  ;;  %v3405_v62 = vld [vmem:[%s4616_s5 + $0x10] sm:$0xff] }
  0xe6   : > { %985 = vmatpush.bf16.msra.mxu0 %v3374_v24  ;;  %v3430_v60 = vld [vmem:[%s4616_s5 + $0xd8] sm:$0xff]  ;;  %v3421_v63 = vld [vmem:[%s4616_s5 + $0x90] sm:$0xff]  ;;  %v3404_v2 = vld [vmem:[%s4616_s5 + $0x8] sm:$0xff] }
  0xe7   : > { %1107 = vmatpush.bf16.msra.mxu2 %v3390_v25  ;;  %v3429_v0 = vld [vmem:[%s4616_s5 + $0xd0] sm:$0xff]  ;;  %v3414_v1 = vld [vmem:[%s4616_s5 + $0x58] sm:$0xff]  ;;  %v3420_v3 = vld [vmem:[%s4616_s5 + $0x88] sm:$0xff] }
  0xe8   : > { %1168 = vmatpush.bf16.msra.mxu3 %v3398_v26  ;;  %v3428_v4 = vld [vmem:[%s4616_s5 + $0xc8] sm:$0xff]  ;;  %v3413_v5 = vld [vmem:[%s4616_s5 + $0x50] sm:$0xff]  ;;  %v3403_v6 = vld [vmem:[%s4616_s5] sm:$0xff] }
  0xe9   : > { %1046 = vmatpush.bf16.msra.mxu1 %v3382_v31  ;;  %v3419_v7 = vld [vmem:[%s4616_s5 + $0x80] sm:$0xff]  ;;  %v3458_v9 = vld [vmem:[%s4617_s1 + $0xb8] sm:$0xff]  ;;  %v3412_v11 = vld [vmem:[%s4616_s5 + $0x48] sm:$0xff] }
  0xea   : > { %986 = vmatpush.bf16.msra.mxu0 %v3373_v28  ;;  %v3427_v8 = vld [vmem:[%s4616_s5 + $0xc0] sm:$0xff]  ;;  %v3466_v10 = vld [vmem:[%s4617_s1 + $0xf8] sm:$0xff]  ;;  %v3457_v12 = vld [vmem:[%s4617_s1 + $0xb0] sm:$0xff] }
  0xeb   : > { %1108 = vmatpush.bf16.msra.mxu2 %v3389_v29  ;;  %v3465_v13 = vld [vmem:[%s4617_s1 + $0xf0] sm:$0xff]  ;;  %v3411_v14 = vld [vmem:[%s4616_s5 + $0x40] sm:$0xff]  ;;  %v3450_v15 = vld [vmem:[%s4617_s1 + $0x78] sm:$0xff] }
  0xec   : > { %1169 = vmatpush.bf16.msra.mxu3 %v3397_v30  ;;  %v3456_v16 = vld [vmem:[%s4617_s1 + $0xa8] sm:$0xff]  ;;  %v3449_v18 = vld [vmem:[%s4617_s1 + $0x70] sm:$0xff]  ;;  %v3447_v20 = vld [vmem:[%s4617_s1 + $0x60] sm:$0xff] }
  0xed   : > { %1047 = vmatpush.bf16.msra.mxu1 %v3381_v35  ;;  %v3464_v17 = vld [vmem:[%s4617_s1 + $0xe8] sm:$0xff]  ;;  %v3455_v21 = vld [vmem:[%s4617_s1 + $0xa0] sm:$0xff]  ;;  %v3454_v22 = vld [vmem:[%s4617_s1 + $0x98] sm:$0xff] }
  0xee   : > { %987 = vmatpush.bf16.msra.mxu0 %v3372_v32  ;;  %v3448_v19 = vld [vmem:[%s4617_s1 + $0x68] sm:$0xff]  ;;  %v3446_v23 = vld [vmem:[%s4617_s1 + $0x58] sm:$0xff]  ;;  %v3463_v24 = vld [vmem:[%s4617_s1 + $0xe0] sm:$0xff] }
  0xef   : > { %1109 = vmatpush.bf16.msra.mxu2 %v3388_v33  ;;  %v3445_v25 = vld [vmem:[%s4617_s1 + $0x50] sm:$0xff]  ;;  %v3462_v26 = vld [vmem:[%s4617_s1 + $0xd8] sm:$0xff]  ;;  %v3444_v28 = vld [vmem:[%s4617_s1 + $0x48] sm:$0xff] }
  0xf0   : > { %1170 = vmatpush.bf16.msra.mxu3 %v3396_v34  ;;  %v3453_v27 = vld [vmem:[%s4617_s1 + $0x90] sm:$0xff]  ;;  %v3452_v30 = vld [vmem:[%s4617_s1 + $0x88] sm:$0xff]  ;;  %v3443_v31 = vld [vmem:[%s4617_s1 + $0x40] sm:$0xff] }
  0xf1   : > { %1048 = vmatpush.bf16.msra.mxu1 %v3380_v44  ;;  %v3461_v29 = vld [vmem:[%s4617_s1 + $0xd0] sm:$0xff]  ;;  %v3460_v32 = vld [vmem:[%s4617_s1 + $0xc8] sm:$0xff]  ;;  %v3451_v33 = vld [vmem:[%s4617_s1 + $0x80] sm:$0xff] }
  0xf2   : > { %988 = vmatpush.bf16.msra.mxu0 %v3371_v36  ;;  %v3459_v34 = vld [vmem:[%s4617_s1 + $0xc0] sm:$0xff] }
  0xf3   : > { %1110 = vmatpush.bf16.msra.mxu2 %v3387_v37 }
  0xf4   : > { %1171 = vmatpush.bf16.msra.mxu3 %v3395_v39 }
  0xf5   : > { %989 = vmatmul.bf16.vlgmr.msra.gmra.mxu0 %v4079_v43  ;;  %1049 = vmatpush.bf16.msra.mxu1 %v3379_v48  ;;  %v3584_v48 = vld [vmem:[%s4547_s6] ss:$0 sm:$0xff] }
  0xf6   : > { %1305 = vmatpush.bf16.msrb.mxu0 %v3410_v40  ;;  %1111 = vmatmul.bf16.vlgmr.msra.gmra.mxu2 %v4079_v43 }
  0xf7   : > { %1427 = vmatpush.bf16.msrb.mxu2 %v3426_v41  ;;  %1172 = vmatmul.bf16.vlgmr.msra.gmra.mxu3 %v4079_v43 }
  0xf8   : > { %1488 = vmatpush.bf16.msrb.mxu3 %v3434_v42  ;;  %1050 = vmatmul.bf16.vlgmr.msra.gmra.mxu1 %v4079_v43 }
  0xf9   : > { %1366 = vmatpush.bf16.msrb.mxu1 %v3418_v49 }
  0xfa   : > { %1306 = vmatpush.bf16.msrb.mxu0 %v3409_v45  ;;  %v3587_v45 = vld [vmem:[%s4548_s7] ss:$0 sm:$0xff] }
  0xfb   : > { %1428 = vmatpush.bf16.msrb.mxu2 %v3425_v46 }
  0xfc   : > { %1489 = vmatpush.bf16.msrb.mxu3 %v3433_v47 }
  0xfd   : > { %1367 = vmatpush.bf16.msrb.mxu1 %v3417_v53  ;;  %v3590_v53 = vld [vmem:[%s4548_s7 + $0x1] ss:$0 sm:$0xff] }
  0xfe   : > { %1307 = vmatpush.bf16.msrb.mxu0 %v3408_v50  ;;  %v3588_v50 = vld [vmem:[%s4548_s7 + $0x2] ss:$0 sm:$0xff] }
  0xff   : > { %1429 = vmatpush.bf16.msrb.mxu2 %v3424_v51  ;;  %v3589_v51 = vld [vmem:[%s4548_s7 + $0x3] ss:$0 sm:$0xff] }
 0x100   : > { %1490 = vmatpush.bf16.msrb.mxu3 %v3432_v52 }
 0x101   : > { %1368 = vmatpush.bf16.msrb.mxu1 %v3416_v57 }
 0x102   : > { %1308 = vmatpush.bf16.msrb.mxu0 %v3407_v54 }
 0x103   : > { %1430 = vmatpush.bf16.msrb.mxu2 %v3423_v55 }
 0x104   : > { %1491 = vmatpush.bf16.msrb.mxu3 %v3431_v56 }
 0x105   : > { %1369 = vmatpush.bf16.msrb.mxu1 %v3415_v61 }
 0x106   : > { %1309 = vmatpush.bf16.msrb.mxu0 %v3406_v58 }
 0x107   : > { %1431 = vmatpush.bf16.msrb.mxu2 %v3422_v59 }
 0x108   : > { %1492 = vmatpush.bf16.msrb.mxu3 %v3430_v60 }
 0x109   : > { %1370 = vmatpush.bf16.msrb.mxu1 %v3414_v1 }
 0x10a   : > { %1310 = vmatpush.bf16.msrb.mxu0 %v3405_v62  ;;  %v3583_v62 = vld [vmem:[%s4547_s6 + $0x2] ss:$0 sm:$0xff] }
 0x10b   : > { %1432 = vmatpush.bf16.msrb.mxu2 %v3421_v63 }
 0x10c   : > { %1493 = vmatpush.bf16.msrb.mxu3 %v3429_v0  ;;  %v3585_v0 = vld [vmem:[%s4547_s6 + $0x3] ss:$0 sm:$0xff] }
 0x10d   : > { %1371 = vmatpush.bf16.msrb.mxu1 %v3413_v5 }
 0x10e   : > { %1311 = vmatpush.bf16.msrb.mxu0 %v3404_v2 }
 0x10f   : > { %1433 = vmatpush.bf16.msrb.mxu2 %v3420_v3 }
 0x110   : > { %1494 = vmatpush.bf16.msrb.mxu3 %v3428_v4 }
 0x111   : > { %1372 = vmatpush.bf16.msrb.mxu1 %v3412_v11 }
 0x112   : > { %1312 = vmatpush.bf16.msrb.mxu0 %v3403_v6 }
 0x113   : > { %1434 = vmatpush.bf16.msrb.mxu2 %v3419_v7 }
 0x114   : > { %1495 = vmatpush.bf16.msrb.mxu3 %v3427_v8 }
 0x115   : > { %1313 = vmatmul.bf16.vlgmr.msrb.gmra.mxu0 %v4079_v43  ;;  %1373 = vmatpush.bf16.msrb.mxu1 %v3411_v14  ;;  %v3586_v14 = vld [vmem:[%s4547_s6 + $0x1] ss:$0 sm:$0xff] }
 0x116   : > { %1435 = vmatmul.bf16.vlgmr.msrb.gmra.mxu2 %v4079_v43 }
 0x117   : > { %1751 = vmatpush.bf16.msra.mxu2 %v3458_v9  ;;  %1496 = vmatmul.bf16.vlgmr.msrb.gmra.mxu3 %v4079_v43 }
 0x118   : > { %1812 = vmatpush.bf16.msra.mxu3 %v3466_v10  ;;  %1374 = vmatmul.bf16.vlgmr.msrb.gmra.mxu1 %v4079_v43 }
 0x119   : > { %1690 = vmatpush.bf16.msra.mxu1 %v3450_v15 }
 0x11b   : > { %1752 = vmatpush.bf16.msra.mxu2 %v3457_v12 }
 0x11c   : > { %1813 = vmatpush.bf16.msra.mxu3 %v3465_v13 }
 0x11d   : > { %1691 = vmatpush.bf16.msra.mxu1 %v3449_v18 }
 0x11f   : > { %1753 = vmatpush.bf16.msra.mxu2 %v3456_v16 }
 0x120   : > { %1814 = vmatpush.bf16.msra.mxu3 %v3464_v17  ;;  %v3591_v17 = vld [vmem:[%s4549_s8 + $0x1] ss:$0 sm:$0xff] }
 0x121   : > { %1692 = vmatpush.bf16.msra.mxu1 %v3448_v19 }
 0x123   : > { %1754 = vmatpush.bf16.msra.mxu2 %v3455_v21 }
 0x124   : > { %1815 = vmatpush.bf16.msra.mxu3 %v3463_v24 }
 0x125   : > { %1693 = vmatpush.bf16.msra.mxu1 %v3447_v20  ;;  %v3592_v20 = vld [vmem:[%s4549_s8 + $0x2] ss:$0 sm:$0xff] }
 0x127   : > { %1755 = vmatpush.bf16.msra.mxu2 %v3454_v22 }
 0x128   : > { %1816 = vmatpush.bf16.msra.mxu3 %v3462_v26 }
 0x129   : > { %1694 = vmatpush.bf16.msra.mxu1 %v3446_v23 }
 0x12b   : > { %1756 = vmatpush.bf16.msra.mxu2 %v3453_v27 }
 0x12c   : > { %1817 = vmatpush.bf16.msra.mxu3 %v3461_v29 }
 0x12d   : > { %1695 = vmatpush.bf16.msra.mxu1 %v3445_v25 }
 0x12f   : > { %1757 = vmatpush.bf16.msra.mxu2 %v3452_v30 }
 0x130   : > { %1818 = vmatpush.bf16.msra.mxu3 %v3460_v32 }
 0x131   : > { %1696 = vmatpush.bf16.msra.mxu1 %v3444_v28  ;;  %v3593_v28 = vld [vmem:[%s4549_s8 + $0x3] ss:$0 sm:$0xff] }
 0x133   : > { %1758 = vmatpush.bf16.msra.mxu2 %v3451_v33 }
 0x134   : > { %1819 = vmatpush.bf16.msra.mxu3 %v3459_v34 }
 0x135   : > { %1697 = vmatpush.bf16.msra.mxu1 %v3443_v31 }
 0x136   : > { %1759 = vmatmul.bf16.vlgmr.msra.gmra.mxu2 %v4079_v43 }
 0x137   : > { %1820 = vmatmul.bf16.vlgmr.msra.gmra.mxu3 %v4079_v43 }
 0x138   : > { %1698 = vmatmul.bf16.vlgmr.msra.gmra.mxu1 %v4079_v43 }
 0x172   : > { %v990_v35 = vpop.f32.mrf.mxu0 }
 0x173   : > { %v991_v54 = vadd.f32 %v3584_v48, %v990_v35  ;;  %v3442_v35 = vld [vmem:[%s4617_s1 + $0x38] sm:$0xff] }
 0x174   : > { %1629 = vmatpush.bf16.msra.mxu0 %v3442_v35 }
 0x175   : > { %v1051_v39 = vpop.f32.mrf.mxu1  ;;  %v1825_v63 = vpack.c.bf16 %v991_v54, %v991_v54 }
 0x176   : > { %v1052_v15 = vadd.f32 %v3586_v14, %v1051_v39  ;;  %v3440_v39 = vld [vmem:[%s4617_s1 + $0x28] sm:$0xff] }
 0x178   : > { %v1826_v16 = vpack.c.bf16 %v1052_v15, %v1052_v15 }
 0x179   : > { %v1112_v36 = vpop.f32.mrf.mxu2 }
 0x17a   : > { %v1173_v37 = vpop.f32.mrf.mxu3  ;;  %v992_v40 = vpop.f32.mrf.mxu0  ;;  %v1113_v7 = vadd.f32 %v3583_v62, %v1112_v36  ;;  %v3441_v36 = vld [vmem:[%s4617_s1 + $0x30] sm:$0xff] }
 0x17b   : > { %v1174_v8 = vadd.f32 %v3585_v0, %v1173_v37  ;;  %1630 = vmatpush.bf16.msra.mxu0 %v3441_v36  ;;  %v3439_v40 = vld [vmem:[%s4617_s1 + $0x20] sm:$0xff] }
 0x17c   : > { %v1827_v12 = vpack.c.bf16 %v1113_v7, %v1113_v7 }
 0x17d   : > { %v1053_v44 = vpop.f32.mrf.mxu1  ;;  %v1828_v13 = vpack.c.bf16 %v1174_v8, %v1174_v8 }
 0x17f   : > { %1631 = vmatpush.bf16.msra.mxu0 %v3440_v39 }
 0x181   : > { %v1114_v41 = vpop.f32.mrf.mxu2 }
 0x182   : > { %v1175_v42 = vpop.f32.mrf.mxu3 }
 0x183   : > { %1632 = vmatpush.bf16.msra.mxu0 %v3439_v40 }
 0x192   : > { %v1314_v46 = vpop.f32.mrf.mxu0 }
 0x193   : > { %v1315_v47 = vadd.f32 %v3587_v45, %v1314_v46 }
 0x195   : > { %v1829_v49 = vpack.c.bf16 %v1315_v47, %v1315_v47  ;;  %v1375_v59 = vpop.f32.mrf.mxu1 }
 0x196   : > { %v1376_v61 = vadd.f32 %v3590_v53, %v1375_v59  ;;  %v3436_v59 = vld [vmem:[%s4617_s1 + $0x8] sm:$0xff] }
 0x197   : > { %v1838_v52 = vsel %vm1833_vm1, %v1829_v49, 0 }
 0x198   : > { %1847 = vmatpush.bf16.xpose.msrb.mxu1 %v1838_v52  ;;  %v1830_v3 = vpack.c.bf16 %v1376_v61, %v1376_v61 }
 0x199   : > { %v1436_v55 = vpop.f32.mrf.mxu2 }
 0x19a   : > { %v1497_v56 = vpop.f32.mrf.mxu3  ;;  %v1437_v57 = vadd.f32 %v3588_v50, %v1436_v55  ;;  %v1316_v60 = vpop.f32.mrf.mxu0  ;;  %v1857_v6 = vsel %vm1833_vm1, %v1830_v3, 0 }
 0x19b   : > { %v1498_v58 = vadd.f32 %v3589_v51, %v1497_v56  ;;  %v3435_v60 = vld [vmem:[%s4617_s1] sm:$0xff] }
 0x19c   : > { %v1831_v1 = vpack.c.bf16 %v1437_v57, %v1437_v57  ;;  %v3438_v57 = vld [vmem:[%s4617_s1 + $0x18] sm:$0xff] }
 0x19d   : > { %v1832_v2 = vpack.c.bf16 %v1498_v58, %v1498_v58  ;;  %v1377_v11 = vpop.f32.mrf.mxu1  ;;  %1633 = vmatpush.bf16.msra.mxu0 %v3438_v57  ;;  %v3437_v58 = vld [vmem:[%s4617_s1 + $0x10] sm:$0xff] }
 0x19e   : > { %v1876_v4 = vsel %vm1833_vm1, %v1831_v1, 0 }
 0x19f   : > { %v1895_v5 = vsel %vm1833_vm1, %v1832_v2, 0  ;;  %1885 = vmatpush.bf16.xpose.msrb.mxu2 %v1876_v4  ;;  %3192 = vmatmul.msk.bf16.vlgmr.msrb.gmra.mxu1 %vm1833_vm1, %v1825_v63 }
 0x1a0   : > { %1904 = vmatpush.bf16.xpose.msrb.mxu3 %v1895_v5  ;;  %1866 = vmatpush.bf16.xpose.msra.mxu1 %v1857_v6 }
 0x1a1   : > { %v1438_v9 = vpop.f32.mrf.mxu2  ;;  %1634 = vmatpush.bf16.msra.mxu0 %v3437_v58 }
 0x1a2   : > { %v1499_v10 = vpop.f32.mrf.mxu3 }
 0x1a5   : > { %1635 = vmatpush.bf16.msra.mxu0 %v3436_v59 }
 0x1a6   : > { %3194 = vmatmul.msk.bf16.vlgmr.msrb.gmra.mxu2 %vm1833_vm1, %v1827_v12 }
 0x1a7   : > { %3195 = vmatmul.msk.bf16.vlgmr.msrb.gmra.mxu3 %vm1833_vm1, %v1828_v13 }
 0x1a9   : > { %1636 = vmatpush.bf16.msra.mxu0 %v3435_v60 }
 0x1ac   : > { %1637 = vmatmul.bf16.vlgmr.msra.gmra.mxu0 %v4079_v43 }
 0x1af   : > { %3193 = vmatmul.msk.bf16.vlgmr.msra.gmra.mxu1 %vm1833_vm1, %v1826_v16  ;;  %v3594_v16 = vld [vmem:[%s4549_s8] ss:$0 sm:$0xff] }
 0x1b5   : > { %v1699_v18 = vpop.f32.mrf.mxu1 }
 0x1b6   : > { %v1700_v19 = vadd.f32 %v3591_v17, %v1699_v18 }
 0x1b8   : > { %v1964_v21 = vpack.c.bf16 %v1700_v19, %v1700_v19 }
 0x1b9   : > { %v1760_v23 = vpop.f32.mrf.mxu2 }
 0x1ba   : > { %v1991_v22 = vsel %vm1970_vm2, %v1964_v21, 0  ;;  %v1761_v24 = vadd.f32 %v3592_v20, %v1760_v23  ;;  %v1821_v29 = vpop.f32.mrf.mxu3 }
 0x1bb   : > { %2000 = vmatpush.bf16.msrb.mxu1 %v1991_v22  ;;  %v1822_v31 = vadd.f32 %v3593_v28, %v1821_v29 }
 0x1bc   : > { %v1965_v26 = vpack.c.bf16 %v1761_v24, %v1761_v24 }
 0x1bd   : > { %v1701_v25 = vpop.f32.mrf.mxu1  ;;  %v1966_v32 = vpack.c.bf16 %v1822_v31, %v1822_v31 }
 0x1be   : > { %v2010_v27 = vsel %vm1970_vm2, %v1965_v26, 0 }
 0x1bf   : > { %2019 = vmatpush.bf16.msra.mxu2 %v2010_v27  ;;  %v2029_v33 = vsel %vm1970_vm2, %v1966_v32, 0 }
 0x1c0   : > { %2038 = vmatpush.bf16.msra.mxu3 %v2029_v33 }
 0x1c1   : > { %v1762_v30 = vpop.f32.mrf.mxu2 }
 0x1c2   : > { %v1823_v34 = vpop.f32.mrf.mxu3 }
 0x21c   : > { %v1849_v37 = vpop.f32.mrf.mxu1 }
 0x21d   : > { %v1910_v53 = vmul.f32 0.17677669, %v1849_v37 }
 0x21f   : > { %v1915_v56 = vsel %vm1914_vm3, %v1910_v53, -inf }
 0x224   : > { %v1851_v41 = vpop.f32.mrf.mxu1 }
 0x229   : > { %v1887_v42 = vpop.f32.mrf.mxu2  ;;  %v1638_v17 = vpop.f32.mrf.mxu0 }
 0x22a   : > { %v1906_v44 = vpop.f32.mrf.mxu3  ;;  %v1912_v45 = vmul.f32 0.17677669, %v1887_v42  ;;  %v1639_v18 = vadd.f32 %v3594_v16, %v1638_v17 }
 0x22b   : > { %v1913_v49 = vmul.f32 0.17677669, %v1906_v44 }
 0x22c   : > { %v1921_v46 = vsel %vm1914_vm3, %v1912_v45, -inf  ;;  %v1868_v47 = vpop.f32.mrf.mxu1  ;;  %v1963_v19 = vpack.c.bf16 %v1639_v18, %v1639_v18 }
 0x22d   : > { %1922 = vmax.xlane.f32.xlu0 %v1921_v46  ;;  %v1911_v48 = vmul.f32 0.17677669, %v1868_v47  ;;  %v1924_v54 = vsel %vm1914_vm3, %v1913_v49, -inf }
 0x22e   : > { %v1972_v20 = vsel %vm1970_vm2, %v1963_v19, 0  ;;  %v3282_v19 = vld [vmem:[%s4619_s4 + $0x60] sm:$0xf] }
 0x22f   : > { %v1918_v50 = vsel %vm1914_vm3, %v1911_v48, -inf  ;;  %1981 = vmatpush.bf16.msrb.mxu0 %v1972_v20  ;;  %v3488_v20 = vld [vmem:[%s4619_s4 + $0x64] sm:$0xf0] }
 0x230   : > { %1919 = vmax.xlane.f32.xlu1 %v1918_v50  ;;  %v3472_v50 = vld [vmem:[%s4618_s23 + $0x28] sm:$0xff] }
 0x231   : > { %v1889_v51 = vpop.f32.mrf.mxu2  ;;  %v1640_v21 = vpop.f32.mrf.mxu0 }
 0x232   : > { %v1908_v52 = vpop.f32.mrf.mxu3  ;;  %v3471_v51 = vld [vmem:[%s4618_s23 + $0x20] sm:$0xff] }
 0x233   : > { %v3470_v52 = vld [vmem:[%s4618_s23 + $0x18] sm:$0xff]  ;;  %v3487_v21 = vld [vmem:[%s4619_s4 + $0x64] sm:$0xf] }
 0x234   : > { %v1870_v55 = vpop.f32.mrf.mxu1 }
 0x235   : > { %1925 = vmax.xlane.f32.xlu0 %v1924_v54  ;;  %v3468_v54 = vld [vmem:[%s4618_s23 + $0x8] sm:$0xff]  ;;  %v3467_v55 = vld [vmem:[%s4618_s23] sm:$0xff] }
 0x238   : > { %1916 = vmax.xlane.f32.xlu1 %v1915_v56 }
 0x2a0   : > { %v1923_v61 = vpop.xlane.xlu0 %1922 }
 0x2a1   : > { %v1929_v62 = vsub.f32 %v1912_v45, %v1923_v61 }
 0x2a3   : > { %v1935_v63 = vmul.f32 1.442695, %v1929_v62  ;;  %v1920_v0 = vpop.xlane.xlu1 %1919 }
 0x2a4   : > { %v1928_v1 = vsub.f32 %v1911_v48, %v1920_v0  ;;  %v3474_v48 = vld [vmem:[%s4618_s23 + $0x38] sm:$0xff] }
 0x2a5   : > { %3601 = vpow2.f32 %v1935_v63  ;;  %2130 = vmatpush.bf16.msra.mxu0 %v3474_v48 }
 0x2a6   : > { %v1933_v2 = vmul.f32 1.442695, %v1928_v1 }
 0x2a8   : > { %v1926_v3 = vpop.xlane.xlu0 %1925  ;;  %3603 = vpow2.f32 %v1933_v2 }
 0x2a9   : > { %v1930_v4 = vsub.f32 %v1913_v49, %v1926_v3  ;;  %v3473_v49 = vld [vmem:[%s4618_s23 + $0x30] sm:$0xff] }
 0x2aa   : > { %2131 = vmatpush.bf16.msra.mxu0 %v3473_v49  ;;  %v3252_v49 = vld [vmem:[%s4619_s4 + $0x28] sm:$0xf0] }
 0x2ab   : > { %v3602_v5 = vpop.eup %3601  ;;  %v1937_v6 = vmul.f32 1.442695, %v1930_v4  ;;  %v1917_v7 = vpop.xlane.xlu1 %1916  ;;  %v3726_v4 = vmov 128.0  }
 0x2ac   : > { %v1945_v8 = vsel %vm1914_vm3, %v3602_v5, 0.0  ;;  %v1927_v9 = vsub.f32 %v1910_v53, %v1917_v7  ;;  %v3469_v53 = vld [vmem:[%s4618_s23 + $0x10] sm:$0xff] }
 0x2ad   : > { %3605 = vpow2.f32 %v1937_v6  ;;  %1946 = vadd.xlane.f32.xlu2 %v1945_v8  ;;  %v3490_v6 = vld [vmem:[%s4619_s4 + $0x74] sm:$0xf0]  ;;  %v3489_v7 = vld [vmem:[%s4619_s4 + $0x74] sm:$0xf] }
 0x2ae   : > { %v3604_v10 = vpop.eup %3603  ;;  %v1931_v43 = vmul.f32 1.442695, %v1927_v9  ;;  %2132 = vmatpush.bf16.msra.mxu0 %v3472_v50  ;;  %v3292_v9 = vld [vmem:[%s4619_s4 + $0x78] sm:$0xf0] }
 0x2af   : > { %v1942_v11 = vsel %vm1914_vm3, %v3604_v10, 0.0 }
 0x2b0   : > { %3607 = vpow2.f32 %v1931_v43  ;;  %1943 = vadd.xlane.f32.xlu0 %v1942_v11 }
 0x2b2   : > { %2133 = vmatpush.bf16.msra.mxu0 %v3471_v51  ;;  %v3242_v51 = vld [vmem:[%s4619_s4 + $0x10] sm:$0xf] }
 0x2b3   : > { %v3606_v12 = vpop.eup %3605 }
 0x2b4   : > { %v1948_v13 = vsel %vm1914_vm3, %v3606_v12, 0.0 }
 0x2b5   : > { %1949 = vadd.xlane.f32.xlu2 %v1948_v13 }
 0x2b6   : > { %v3608_v14 = vpop.eup %3607  ;;  %2134 = vmatpush.bf16.msra.mxu0 %v3470_v52  ;;  %v3478_v52 = vld [vmem:[%s4619_s4 + $0x14] sm:$0xf0] }
 0x2b7   : > { %v1939_v15 = vsel %vm1914_vm3, %v3608_v14, 0.0 }
 0x2b8   : > { %1940 = vadd.xlane.f32.xlu1 %v1939_v15 }
 0x2ba   : > { %2135 = vmatpush.bf16.msra.mxu0 %v3469_v53  ;;  %v3477_v53 = vld [vmem:[%s4619_s4 + $0x14] sm:$0xf] }
 0x2be   : > { %2136 = vmatpush.bf16.msra.mxu0 %v3468_v54  ;;  %v3243_v54 = vor.u32 %v3478_v52, %v3242_v51 }
 0x2c2   : > { %2137 = vmatpush.bf16.msra.mxu0 %v3467_v55  ;;  %v3244_v55 = vld [vmem:[%s4619_s4 + $0x18] sm:$0xf0] }
 0x320   : > { %v1947_v22 = vpop.xlane.xlu2 %1946 }
 0x321   : > { %3609 = vrcp.f32 %v1947_v22  ;;  %v3283_v22 = vor.u32 %v3488_v20, %v3282_v19 }
 0x323   : > { %v1944_v23 = vpop.xlane.xlu0 %1943 }
 0x324   : > { %3611 = vrcp.f32 %v1944_v23  ;;  %v3284_v23 = vld [vmem:[%s4619_s4 + $0x68] sm:$0xf0] }
 0x327   : > { %v3610_v24 = vpop.eup %3609 }
 0x328   : > { %v1957_v25 = vmul.f32 %v3610_v24, %v3602_v5  ;;  %v1950_v26 = vpop.xlane.xlu2 %1949  ;;  %v3290_v5 = vld [vmem:[%s4619_s4 + $0x70] sm:$0xf]  ;;  %v3287_v24 = vor.u32 %v3487_v21, %v3284_v23  ;;  %v3496_v21 = vld [vmem:[%s3934_s22 + $0x28] sm:$0xff] }
 0x329   : > { %3613 = vrcp.f32 %v1950_v26  ;;  %v3291_v8 = vor.u32 %v3490_v6, %v3290_v5  ;;  %v3486_v26 = vld [vmem:[%s4619_s4 + $0x54] sm:$0xf0] }
 0x32a   : > { %v1961_v27 = vpack.c.bf16 %v1957_v25, %v1957_v25  ;;  %v3612_v28 = vpop.eup %3611  ;;  %v3274_v25 = vld [vmem:[%s4619_s4 + $0x50] sm:$0xf] }
 0x32b   : > { %v1956_v29 = vmul.f32 %v3612_v28, %v3604_v10  ;;  %v1941_v30 = vpop.xlane.xlu1 %1940  ;;  %v3295_v10 = vor.u32 %v3489_v7, %v3292_v9  ;;  %2284 = vmatpush.bf16.msra.mxu1 %v3291_v8  ;;  %v3275_v28 = vor.u32 %v3486_v26, %v3274_v25  ;;  %v3596_v8 = vld [vmem:[%s781_s24] ss:$0 sm:$0xff] }
 0x32c   : > { %3198 = vmatmul.msk.bf16.vlgmr.msra.gmra.mxu2 %vm1914_vm3, %v1961_v27  ;;  %3615 = vrcp.f32 %v1941_v30  ;;  %v3485_v27 = vld [vmem:[%s4619_s4 + $0x54] sm:$0xf]  ;;  %v3495_v26 = vld [vmem:[%s3934_s22 + $0x20] sm:$0xff] }
 0x32d   : > { %v1960_v31 = vpack.c.bf16 %v1956_v29, %v1956_v29  ;;  %3617 = vrcp.f32 %v3726_v4  ;;  %2297 = vmatpush.bf16.msrb.mxu2 %v3295_v10  ;;  %v3276_v29 = vld [vmem:[%s4619_s4 + $0x58] sm:$0xf0] }
 0x32e   : > { %v3279_v30 = vor.u32 %v3485_v27, %v3276_v29 }
 0x32f   : > { %v3614_v32 = vpop.eup %3613  ;;  %3197 = vmatmul.msk.bf16.vlgmr.msrb.gmra.mxu1 %vm1914_vm3, %v1960_v31  ;;  %v3266_v31 = vld [vmem:[%s4619_s4 + $0x40] sm:$0xf] }
 0x330   : > { %v1958_v33 = vmul.f32 %v3614_v32, %v3606_v12  ;;  %2285 = vmatpush.bf16.msra.mxu1 %v3283_v22  ;;  %v3484_v32 = vld [vmem:[%s4619_s4 + $0x44] sm:$0xf0] }
 0x331   : > { %2298 = vmatpush.bf16.msrb.mxu2 %v3287_v24  ;;  %v3505_v24 = vld [vmem:[%s3934_s22 + $0x70] sm:$0xff] }
 0x332   : > { %v1962_v34 = vpack.c.bf16 %v1958_v33, %v1958_v33  ;;  %v3616_v35 = vpop.eup %3615  ;;  %v3483_v33 = vld [vmem:[%s4619_s4 + $0x44] sm:$0xf] }
 0x333   : > { %v1955_v36 = vmul.f32 %v3616_v35, %v3608_v14  ;;  %v3618_v43 = vpop.eup %3617  ;;  %v3268_v35 = vld [vmem:[%s4619_s4 + $0x48] sm:$0xf0] }
 0x334   : > { %3199 = vmatmul.msk.bf16.vlgmr.msra.gmra.mxu3 %vm1914_vm3, %v1962_v34  ;;  %v2149_v11 = vmul.f32 128.0, %v3618_v43  ;;  %vm2153_vm6 = vweird.f32 %v3618_v43  ;;  %2286 = vmatpush.bf16.msra.mxu1 %v3275_v28  ;;  %v3267_v34 = vor.u32 %v3484_v32, %v3266_v31 }
 0x335   : > { %v1959_v37 = vpack.c.bf16 %v1955_v36, %v1955_v36  ;;  %2299 = vmatpush.bf16.msrb.mxu2 %v3279_v30  ;;  %v3271_v36 = vor.u32 %v3483_v33, %v3268_v35  ;;  %v3504_v30 = vld [vmem:[%s3934_s22 + $0x68] sm:$0xff] }
 0x336   : > { %v2150_v12 = vsub.f32 1.0, %v2149_v11 }
 0x337   : > { %3196 = vmatmul.msk.bf16.vlgmr.msrb.gmra.mxu0 %vm1914_vm3, %v1959_v37  ;;  %v3258_v37 = vld [vmem:[%s4619_s4 + $0x30] sm:$0xf] }
 0x338   : > { %2287 = vmatpush.bf16.msra.mxu1 %v3267_v34  ;;  %v3494_v34 = vld [vmem:[%s3934_s22 + $0x18] sm:$0xff] }
 0x339   : > { %2300 = vmatpush.bf16.msrb.mxu2 %v3271_v36 }
 0x3ac   : > { %v2002_v39 = vpop.f32.mrf.mxu1 }
 0x3ad   : > { %2045 = vrot.lane.b32.xlu2 %v2002_v39, %s3723_s30  ;;  %v3482_v39 = vld [vmem:[%s4619_s4 + $0x34] sm:$0xf0] }
 0x3af   : > { %v2021_v40 = vpop.f32.mrf.mxu2 }
 0x3b0   : > { %2049 = vrot.lane.b32.xlu0 %v2021_v40, %s3724_s10  ;;  %v3481_v40 = vld [vmem:[%s4619_s4 + $0x34] sm:$0xf]  ;;  %s4623_s10 = scalar_lea.vmem %s4559_s18, %s3914_s0 }
 0x3b4   : > { %v1983_v41 = vpop.f32.mrf.mxu0  ;;  %v2004_v42 = vpop.f32.mrf.mxu1 }
 0x3b5   : > { %v3260_v42 = vld [vmem:[%s4619_s4 + $0x38] sm:$0xf0] }
 0x3b7   : > { %v2023_v44 = vpop.f32.mrf.mxu2  ;;  %v2040_v45 = vpop.f32.mrf.mxu3 }
 0x3b8   : > { %2053 = vrot.lane.b32.xlu1 %v2040_v45, %s3725_s3  ;;  %s4620_s3 = sld [smem:[#allocation26_spill]]  ;;  %v3263_v44 = vor.u32 %v3481_v40, %v3260_v42  ;;  %v3250_v45 = vld [vmem:[%s4619_s4 + $0x20] sm:$0xf] }
 0x3ba   : > { %2301 = vmatpush.bf16.msrb.mxu2 %v3263_v44  ;;  %v3493_v44 = vld [vmem:[%s3934_s22 + $0x10] sm:$0xff] }
 0x3bc   : > { %v1985_v46 = vpop.f32.mrf.mxu0 }
 0x3bd   : > { %v3480_v46 = vld [vmem:[%s4619_s4 + $0x24] sm:$0xf0] }
 0x3be   : > { %v3595_v63 = vld [vmem:[%s4620_s3] ss:$0 sm:$0xff]  ;;  %v3251_v48 = vor.u32 %v3480_v46, %v3250_v45 }
 0x3bf   : > { %v2042_v47 = vpop.f32.mrf.mxu3 }
 0x3c0   : > { %v3479_v47 = vld [vmem:[%s4619_s4 + $0x24] sm:$0xf] }
 0x3c1   : > { %v3255_v50 = vor.u32 %v3479_v47, %v3252_v49 }
 0x3c3   : > { %2302 = vmatpush.bf16.msrb.mxu2 %v3255_v50 }
 0x407   : > { %v2046_v56 = vpop.permute.xlu2 %2045 }
 0x408   : > { %v2056_v58 = vsel %vm1833_vm1, %v1983_v41, %v2046_v56  ;;  %v3259_v41 = vor.u32 %v3482_v39, %v3258_v37  ;;  %v3247_v56 = vor.u32 %v3477_v53, %v3244_v55  ;;  %v3503_v39 = vld [vmem:[%s3934_s22 + $0x60] sm:$0xff]  ;;  %v3492_v53 = vld [vmem:[%s3934_s22 + $0x8] sm:$0xff] }
 0x40a   : > { %2288 = vmatpush.bf16.msra.mxu1 %v3259_v41  ;;  %2303 = vmatpush.bf16.msrb.mxu2 %v3247_v56 }
 0x40e   : > { %2289 = vmatpush.bf16.msra.mxu1 %v3251_v48  ;;  %v3502_v48 = vld [vmem:[%s3934_s22 + $0x58] sm:$0xff] }
 0x412   : > { %2290 = vmatpush.bf16.msra.mxu1 %v3243_v54 }
 0x422   : > { %v2050_v57 = vpop.permute.xlu0 %2049 }
 0x423   : > { %v2058_v59 = vsel %vm2057_vm4, %v2056_v58, %v2050_v57  ;;  %v3234_v57 = vld [vmem:[%s4619_s4] sm:$0xf]  ;;  %v3476_v58 = vld [vmem:[%s4619_s4 + $0x4] sm:$0xf0] }
 0x42a   : > { %v2054_v60 = vpop.permute.xlu1 %2053 }
 0x42b   : > { %v2060_v61 = vsel %vm2059_vm5, %v2058_v59, %v2054_v60  ;;  %v3475_v59 = vld [vmem:[%s4619_s4 + $0x4] sm:$0xf]  ;;  %v3235_v60 = vor.u32 %v3476_v58, %v3234_v57  ;;  %v3501_v57 = vld [vmem:[%s3934_s22 + $0x50] sm:$0xff] }
 0x42c   : > { %v2061_v62 = vpack.c.bf16 %v2060_v61, %v2060_v61  ;;  %v3236_v61 = vld [vmem:[%s4619_s4 + $0x8] sm:$0xf0] }
 0x42d   : > { %2291 = vmatpush.bf16.msra.mxu1 %v3235_v60 }
 0x42e   : > { %2138 = vmatmul.bf16.vlgmr.msra.gmra.mxu0 %v2061_v62  ;;  %v3239_v62 = vor.u32 %v3475_v59, %v3236_v61 }
 0x430   : > { %2304 = vmatpush.bf16.msrb.mxu2 %v3239_v62  ;;  %v3491_v62 = vld [vmem:[%s3934_s22] sm:$0xff] }
 0x4ab   : > { %v2139_v0 = vpop.f32.mrf.mxu0 }
 0x4ac   : > { %v2140_v1 = vadd.f32 %v3595_v63, %v2139_v0 }
 0x4ae   : > { %v2143_v2 = vadd.f32 %v2140_v1, %v4063_v38  ;;  %v2151_v38 = vmul.f32 %v3618_v43, %v2150_v12 }
 0x4b0   : > { %2146 = vadd.xlane.f32.xlu2 %v2143_v2  ;;  %v2152_v13 = vadd.f32 %v3618_v43, %v2151_v38 }
 0x4b2   : > { %v4375_v14 = vsel %vm2153_vm6, %v3618_v43, %v2152_v13  ;;  %v3597_v43 = vld [vmem:[%s784_s26] ss:$0 sm:$0xff]  ;;  %v3498_v13 = vld [vmem:[%s3934_s22 + $0x38] sm:$0xff] }
 0x4b3   : > { %v2141_v3 = vpop.f32.mrf.mxu0  ;;  %2532 = vmatpush.bf16.msrb.mxu3 %v3498_v13 }
 0x523   : > { %v2147_v15 = vpop.xlane.xlu2 %2146 }
 0x524   : > { %v2155_v16 = vmul.f32 %v4375_v14, %v2147_v15  ;;  %v2198_v15 = vld [vmem:[%s3929_s29] sm:$0x3] }
 0x525   : > { %v2201_v23 = vperm.slane %v2198_v15, 1 }
 0x526   : > { %v4378_v17 = vsub.f32 %v2143_v2, %v2155_v16  ;;  %v2200_v16 = vperm.slane %v2198_v15, 0 }
 0x528   : > { %v2157_v18 = vmul.f32 %v4378_v17, %v4378_v17 }
 0x52a   : > { %2158 = vadd.xlane.f32.xlu0 %v2157_v18  ;;  %v3506_v18 = vld [vmem:[%s3934_s22 + $0x78] sm:$0xff] }
 0x52b   : > { %2545 = vmatpush.bf16.msrb.mxu0 %v3506_v18 }
 0x52f   : > { %2546 = vmatpush.bf16.msrb.mxu0 %v3505_v24 }
 0x533   : > { %2547 = vmatpush.bf16.msrb.mxu0 %v3504_v30 }
 0x537   : > { %2548 = vmatpush.bf16.msrb.mxu0 %v3503_v39 }
 0x53b   : > { %2549 = vmatpush.bf16.msrb.mxu0 %v3502_v48 }
 0x53f   : > { %2550 = vmatpush.bf16.msrb.mxu0 %v3501_v57 }
 0x59d   : > { %v2159_v63 = vpop.xlane.xlu0 %2158 }
 0x59e   : > { %v2160_v0 = vmul.f32 %v2159_v63, %v4375_v14 }
 0x5a0   : > { %v2161_v1 = vadd.f32 1e-05, %v2160_v0 }
 0x5a2   : > { %3619 = vrsqrt.f32 %v2161_v1  ;;  %vm2168_vm8 = vweird.f32 %v2161_v1 }
 0x5a8   : > { %v3620_v2 = vpop.eup %3619 }
 0x5a9   : > { %v2163_v3 = vmul.f32 %v3620_v2, %v2161_v1  ;;  %vm2169_vm7 = vweird.f32 %v3620_v2 }
 0x5aa   : > { %vm2170_vm9 = vmor %vm2168_vm8, %vm2169_vm7 }
 0x5ab   : > { %v2164_v4 = vmul.f32 %v3620_v2, %v2163_v3 }
 0x5ad   : > { %v2165_v5 = vmul.f32 0.5, %v2164_v4 }
 0x5af   : > { %v2166_v6 = vsub.f32 1.5, %v2165_v5 }
 0x5b1   : > { %v2167_v7 = vmul.f32 %v3620_v2, %v2166_v6 }
 0x5b3   : > { %v2171_v9 = vsel %vm2170_vm9, %v3620_v2, %v2167_v7  ;;  %v3500_v2 = vld [vmem:[%s3934_s22 + $0x48] sm:$0xff] }
 0x5b4   : > { %v2172_v10 = vmul.f32 %v2171_v9, %v4378_v17  ;;  %v3497_v17 = vld [vmem:[%s3934_s22 + $0x30] sm:$0xff]  ;;  %2551 = vmatpush.bf16.msrb.mxu0 %v3500_v2  ;;  %v3499_v9 = vld [vmem:[%s3934_s22 + $0x40] sm:$0xff]  ;;  %s4621_s22 = scalar_lea.vmem %s4555_s14, %s3914_s0 }
 0x5b5   : > { %2533 = vmatpush.bf16.msrb.mxu3 %v3497_v17 }
 0x5b6   : > { %v2176_v11 = vmul.f32 %v3596_v8, %v2172_v10 }
 0x5b8   : > { %v4422_v12 = vadd.f32 %v3597_v43, %v2176_v11  ;;  %2552 = vmatpush.bf16.msrb.mxu0 %v3499_v9 }
 0x5b9   : > { %2534 = vmatpush.bf16.msrb.mxu3 %v3496_v21 }
 0x5ba   : > { %v2181_v38 = vpack.c.bf16 %v4422_v12, %v4422_v12 }
 0x5bc   : > { %2292 = vmatmul.bf16.vlgmr.msra.gmra.mxu1 %v2181_v38  ;;  %2305 = vmatmul.bf16.vlgmr.msrb.gmra.mxu2 %v2181_v38 }
 0x5bd   : > { %2535 = vmatpush.bf16.msrb.mxu3 %v3495_v26 }
 0x5c1   : > { %2536 = vmatpush.bf16.msrb.mxu3 %v3494_v34 }
 0x5c5   : > { %2537 = vmatpush.bf16.msrb.mxu3 %v3493_v44 }
 0x5c9   : > { %2538 = vmatpush.bf16.msrb.mxu3 %v3492_v53 }
 0x5cd   : > { %2539 = vmatpush.bf16.msrb.mxu3 %v3491_v62 }
 0x639   : > { %v2293_v19 = vpop.f32.mrf.mxu1 }
 0x63a   : > { %v4430_v20 = vadd.f32 %v2293_v19, %v2200_v16 }
 0x63c   : > { %v4434_v22 = vmul.f32 0.70710677, %v4430_v20 }
 0x63e   : > { %v2314_v25 = vmul.f32 %v4434_v22, %v4434_v22 }
 0x63f   : > { %v2306_v27 = vpop.f32.mrf.mxu2 }
 0x640   : > { %v4440_v28 = vmin.f32 %v2314_v25, 16.0  ;;  %v4442_v29 = vadd.f32 %v2306_v27, %v2201_v23 }
 0x641   : > { %v2295_v31 = vpop.f32.mrf.mxu1 }
 0x642   : > { %v2316_v32 = vmul.f32 2.1237322e-06, %v4440_v28  ;;  %v2327_v33 = vmul.f32 3.8918573e-05, %v4440_v28  ;;  %v4449_v35 = vmul.f32 0.70710677, %v4442_v29 }
 0x644   : > { %v2317_v36 = vadd.f32 0.00028619796, %v2316_v32  ;;  %v2328_v37 = vadd.f32 0.001143296, %v2327_v33  ;;  %v2354_v40 = vmul.f32 %v4449_v35, %v4449_v35 }
 0x646   : > { %v2318_v41 = vmul.f32 %v2317_v36, %v4440_v28  ;;  %v2329_v42 = vmul.f32 %v2328_v37, %v4440_v28  ;;  %v2355_v45 = vmin.f32 %v2354_v40, 16.0 }
 0x647   : > { %v2308_v46 = vpop.f32.mrf.mxu2 }
 0x648   : > { %v2330_v47 = vadd.f32 0.014752088, %v2329_v42  ;;  %v2319_v49 = vadd.f32 0.0036580483, %v2318_v41  ;;  %v2356_v50 = vmul.f32 2.1237322e-06, %v2355_v45 }
 0x649   : > { %v2367_v51 = vmul.f32 3.8918573e-05, %v2355_v45 }
 0x64a   : > { %v2331_v52 = vmul.f32 %v2330_v47, %v4440_v28  ;;  %v2357_v54 = vadd.f32 0.00028619796, %v2356_v50  ;;  %v2320_v58 = vmul.f32 %v2319_v49, %v4440_v28  ;;  %v2310_v50 = vmul.f32 0.5, %v4430_v20  ;;  %v3598_v20 = vld [vmem:[%s4621_s22] ss:$0 sm:$0xff] }
 0x64b   : > { %v2368_v55 = vadd.f32 0.001143296, %v2367_v51 }
 0x64c   : > { %v2332_v56 = vadd.f32 0.112945676, %v2331_v52  ;;  %v2358_v59 = vmul.f32 %v2357_v54, %v2355_v45  ;;  %v2321_v3 = vadd.f32 0.05243302, %v2320_v58  ;;  %v2311_v58 = vmul.f32 0.5, %v4442_v29 }
 0x64d   : > { %v2369_v60 = vmul.f32 %v2368_v55, %v2355_v45 }
 0x64e   : > { %v2333_v61 = vmul.f32 %v2332_v56, %v4440_v28  ;;  %v2359_v1 = vadd.f32 0.0036580483, %v2358_v59  ;;  %v2322_v10 = vmul.f32 %v2321_v3, %v4440_v28 }
 0x64f   : > { %v2370_v63 = vadd.f32 0.014752088, %v2369_v60 }
 0x650   : > { %v2334_v0 = vadd.f32 0.4994258, %v2333_v61  ;;  %v2360_v8 = vmul.f32 %v2359_v1, %v2355_v45  ;;  %v2323_v13 = vadd.f32 0.18741608, %v2322_v10 }
 0x651   : > { %v2371_v4 = vmul.f32 %v2370_v63, %v2355_v45 }
 0x652   : > { %v2335_v5 = vmul.f32 %v2334_v0, %v4440_v28  ;;  %v2361_v38 = vadd.f32 0.05243302, %v2360_v8  ;;  %v2324_v19 = vmul.f32 %v2323_v13, %v4440_v28 }
 0x653   : > { %v2372_v6 = vadd.f32 0.112945676, %v2371_v4 }
 0x654   : > { %v2336_v7 = vadd.f32 1.0, %v2335_v5  ;;  %v2362_v18 = vmul.f32 %v2361_v38, %v2355_v45  ;;  %v2325_v26 = vadd.f32 1.1283791, %v2324_v19 }
 0x655   : > { %v2373_v43 = vmul.f32 %v2372_v6, %v2355_v45 }
 0x656   : > { %3621 = vrcp.f32 %v2336_v7  ;;  %v2348_v24 = vand.u32 2147483648, %v2336_v7  ;;  %v2363_v25 = vadd.f32 0.18741608, %v2362_v18  ;;  %v2346_v30 = vand.u32 2147483647, %v2336_v7 }
 0x657   : > { %v2374_v11 = vadd.f32 0.4994258, %v2373_v43  ;;  %vm2342_vm11 = vweird.f32 %v2336_v7  ;;  %v2326_v37 = vmul.f32 %v2325_v26, %v4434_v22 }
 0x658   : > { %v2349_v33 = vor.u32 1.1754944e-38, %v2348_v24  ;;  %v2364_v34 = vmul.f32 %v2363_v25, %v2355_v45  ;;  %vm2347_vm13 = vcmp.eq.f32.partialorder %v2346_v30, 8.507059e+37 }
 0x659   : > { %v2375_v15 = vmul.f32 %v2374_v11, %v2355_v45 }
 0x65a   : > { %v2365_v44 = vadd.f32 1.1283791, %v2364_v34 }
 0x65b   : > { %v2376_v16 = vadd.f32 1.0, %v2375_v15  ;;  %v3599_v15 = vld [vmem:[%s4622_s12] ss:$0 sm:$0xff] }
 0x65c   : > { %v3622_v17 = vpop.eup %3621  ;;  %v2366_v22 = vmul.f32 %v2365_v44, %v4449_v35 }
 0x65d   : > { %v2338_v21 = vmul.f32 %v3622_v17, %v2336_v7  ;;  %3623 = vrcp.f32 %v2376_v16  ;;  %vm2343_vm10 = vweird.f32 %v3622_v17  ;;  %v2388_v42 = vand.u32 2147483648, %v2376_v16 }
 0x65e   : > { %vm2344_vm12 = vmor %vm2342_vm11, %vm2343_vm10  ;;  %v2386_v47 = vand.u32 2147483647, %v2376_v16  ;;  %vm2382_vm15 = vweird.f32 %v2376_v16 }
 0x65f   : > { %v2339_v23 = vsub.f32 1.0, %v2338_v21  ;;  %v2389_v45 = vor.u32 1.1754944e-38, %v2388_v42 }
 0x660   : > { %vm2387_vm1 = vcmp.eq.f32.partialorder %v2386_v47, 8.507059e+37 }
 0x661   : > { %v2340_v27 = vmul.f32 %v3622_v17, %v2339_v23 }
 0x663   : > { %v3624_v31 = vpop.eup %3623  ;;  %v2341_v32 = vadd.f32 %v3622_v17, %v2340_v27 }
 0x664   : > { %v2378_v36 = vmul.f32 %v3624_v31, %v2376_v16  ;;  %vm2383_vm14 = vweird.f32 %v3624_v31 }
 0x665   : > { %v2345_v39 = vsel %vm2344_vm12, %v3622_v17, %v2341_v32  ;;  %vm2384_vm0 = vmor %vm2382_vm15, %vm2383_vm14 }
 0x666   : > { %v2350_v28 = vsel %vm2347_vm13, %v2349_v33, %v2345_v39  ;;  %v2379_v40 = vsub.f32 1.0, %v2378_v36 }
 0x667   : > { %v2351_v41 = vmul.f32 %v2350_v28, %v2326_v37 }
 0x668   : > { %v2380_v46 = vmul.f32 %v3624_v31, %v2379_v40 }
 0x669   : > { %v3296_v48 = vclamps-f32 %v2351_v41, 1.0 }
 0x66a   : > { %v2381_v49 = vadd.f32 %v3624_v31, %v2380_v46 }
 0x66b   : > { %v2394_v51 = vadd.f32 1.0, %v3296_v48 }
 0x66c   : > { %v2385_v52 = vsel %vm2384_vm0, %v3624_v31, %v2381_v49 }
 0x66d   : > { %v2396_v53 = vmul.f32 %v2394_v51, %v2310_v50  ;;  %v2390_v54 = vsel %vm2387_vm1, %v2389_v45, %v2385_v52 }
 0x66e   : > { %v2391_v55 = vmul.f32 %v2390_v54, %v2366_v22 }
 0x66f   : > { %v2398_v56 = vpack.c.bf16 %v2396_v53, %v2396_v53 }
 0x670   : > { %v3297_v57 = vclamps-f32 %v2391_v55, 1.0 }
 0x671   : > { %2540 = vmatmul.bf16.vlgmr.msrb.gmra.mxu3 %v2398_v56 }
 0x672   : > { %v2395_v59 = vadd.f32 1.0, %v3297_v57 }
 0x674   : > { %v2397_v60 = vmul.f32 %v2395_v59, %v2311_v58 }
 0x676   : > { %v2399_v61 = vpack.c.bf16 %v2397_v60, %v2397_v60 }
 0x678   : > { %2553 = vmatmul.bf16.vlgmr.msrb.gmra.mxu0 %v2399_v61 }
 0x6f4   : > { %v2541_v35 = vpop.f32.mrf.mxu3 }
 0x6f5   : > { %v2542_v62 = vadd.f32 %v3598_v20, %v2541_v35  ;;  %v2554_v63 = vpop.f32.mrf.mxu0 }
 0x6f7   : > { %v2555_v0 = vadd.f32 %v2554_v63, %v2542_v62 }
 0x6f9   : > { %v2558_v1 = vadd.f32 %v2555_v0, %v4422_v12 }
 0x6fb   : > { %2561 = vadd.xlane.f32.xlu1 %v2558_v1 }
 0x6fc   : > { %v2543_v2 = vpop.f32.mrf.mxu3 }
 0x6fd   : > { %v2556_v3 = vpop.f32.mrf.mxu0 }
 0x76e   : > { %v2562_v4 = vpop.xlane.xlu1 %2561 }
 0x76f   : > { %v2563_v29 = vmul.f32 %v2562_v4, %v4375_v14 }
 0x771   : > { %v2564_v5 = vsub.f32 %v2558_v1, %v2563_v29 }
 0x773   : > { %v2565_v6 = vmul.f32 %v2564_v5, %v2564_v5 }
 0x775   : > { %2566 = vadd.xlane.f32.xlu2 %v2565_v6 }
 0x7e8   : > { %v2567_v7 = vpop.xlane.xlu2 %2566 }
 0x7e9   : > { %v2568_v8 = vmul.f32 %v2567_v7, %v4375_v14  ;;  %v3600_v14 = vld [vmem:[%s4623_s10] ss:$0 sm:$0xff] }
 0x7eb   : > { %v2569_v9 = vadd.f32 1e-05, %v2568_v8 }
 0x7ed   : > { %3625 = vrsqrt.f32 %v2569_v9  ;;  %vm2576_vm3 = vweird.f32 %v2569_v9 }
 0x7f3   : > { %v3626_v10 = vpop.eup %3625 }
 0x7f4   : > { %v2571_v43 = vmul.f32 %v3626_v10, %v2569_v9  ;;  %vm2577_vm2 = vweird.f32 %v3626_v10 }
 0x7f5   : > { %vm2578_vm4 = vmor %vm2576_vm3, %vm2577_vm2 }
 0x7f6   : > { %v2572_v11 = vmul.f32 %v3626_v10, %v2571_v43 }
 0x7f8   : > { %v2573_v12 = vmul.f32 0.5, %v2572_v11 }
 0x7fa   : > { %v2574_v38 = vsub.f32 1.5, %v2573_v12 }
 0x7fc   : > { %v2575_v13 = vmul.f32 %v3626_v10, %v2574_v38 }
 0x7fe   : > { %v2579_v16 = vsel %vm2578_vm4, %v3626_v10, %v2575_v13 }
 0x7ff   : > { %v2580_v17 = vmul.f32 %v2579_v16, %v2564_v5 }
 0x801   : > { %v2584_v18 = vmul.f32 %v3599_v15, %v2580_v17  ;;  %2593 = sbr.rel (%p3362_p1) target bundleno = 2186 (0x88a), region = 112 }
 0x803   : > { %v2588_v19 = vadd.f32 %v3600_v14, %v2584_v18 }
 0x805   : > { %2589 = vst [vmem:[#allocation2] sm:$0xff] %v2588_v19 }
 0x806   : > { %2612 = vmatpush.xpose.msra.mxu0 %v2588_v19  ;;  %v2594_v21 = vld [vmem:[%s4624_s19] sm:$0x1]  ;;  %v2596_v23 = vstv %s2595_s11  ;;  %vm2617_vm5 = vcmask 57344  }
 0x809   : > { %2613 = vmatmul.f32.vlgmr.msra.gmra.mxu0 %v2594_v21 }
 0x886   : > { %v2614_v24 = vpop.f32.mrf.mxu0 }
 0x887   : > { %v2615_v25 = vadd.f32 %v2614_v24, %v2596_v23 }
 0x889   : > { %2618 = vst.msk [vmem:[%s3958_s13] sm:$0x1] %vm2617_vm5, %v2615_v25 }
 0x88a PF: > { %s4625_s0 = sld [smem:[#allocation9_spill]]  ;;  %s2630_s20 = sshll.u32 %s3958_s13, 4  ;;  %s2631_s20 = int_to_ptr.vmem [resolvable:$true] %s2630_s20 }
 0x88b   : > { %s4626_s29 = sld [smem:[#allocation31_spill]]  ;;  %s4629_s4 = sand.u32 1, %s3697_s27  }
 0x88c   : > { %s2620_s30 = scalar_lea.sflag [#allocation5], %s4629_s4 }
 0x891   : > { %s4627_s22 = smov %s4626_s29  ;;  %s2628_s24 = scalar_lea.hbm %s4626_s29, %s4625_s0 }
 0x892   : > { %s2632_s12 = sshll.u32 %s2628_s24, 4  ;;  %s3647_s11 = scalar_lea.hbm %s4627_s22, 2  ;;  %s2633_s12 = int_to_ptr.hbm [resolvable:$true] %s2632_s12 }
 0x893   : > { %s3641_s10 = sshra.s32 %s2633_s12, 4  ;;  %s3642_s10 = int_to_ptr.hbm [resolvable:$true] %s3641_s10 }
 0x894   : > { %s3643_s3 = scalar_lea.hbm %s3642_s10, 1  ;;  %p3648_p6 = scmp.lt.s32.totalorder %s3642_s10, %s4627_s22 }
 0x895   : > { %p3644_p2 = scmp.ne.s32.totalorder %s3642_s10, %s3643_s3  ;;  %p3649_p7 = scmp.lt.s32.totalorder %s3647_s11, %s3643_s3 }
 0x897   : > { %p3645_p4 = pnand %p3644_p2, %p3889_p3  ;;  %p3650_p8 = por %p3649_p7, %p3648_p6 }
 0x899   : > { %p3646_p5 = pneg %p3645_p4 }
 0x89b   : > { %p3651_p10 = pnand %p3650_p8, %p3646_p5 }
 0x89d   : > { %3654 = shalt.err (!%p3651_p10)
}
 0x89e   : > { %3507 = dma.vmem_to_hbm [thread:$0]  (%p3889_p3), %s2631_s20, 16, %s2633_s12, %s2620_s30  }
 0x89f PF: > { %s4630_s13 = sld [smem:[#allocation12_spill]] }
 0x8a0   : > { %s4631_s0 = sld [smem:[#allocation7_spill]] }
 0x8a5   : > { %p3513_p11 = scmp.ge.s32.totalorder %s4630_s13, 2 }
 0x8a6   : > { %s2644_s24 = sand.u32 1, %s4631_s0  }
 0x8a7   : > { %p3510_p12 = pnand %p3513_p11, %p3899_p9  ;;  %s2645_s4 = scalar_lea.sflag [#allocation5], %s2644_s24 }
 0x8a9   : > { %p3511_p13 = pneg %p3510_p12 }
 0x8ab   : > { %3688 = dma.done.wait (%p3511_p13), %s2645_s4, 16  }
 0x8ac   : > { %3690 = vsyncadd (%p3511_p13), %s2645_s4, 4294967280  ;;  %s35_s30 = sadd.s32 1, %s4630_s13   ;;  %s4633_s10 = sld [smem:[#allocation8_spill]] }
 0x8ad   : > { %p32_p0 = scmp.ge.s32.totalorder %s35_s30, 6   ;;  %s4634_s3 = sld [smem:[#allocation17_spill]] }
 0x8ae   : > { %s4635_s28 = sld [smem:[#allocation10_spill]]  ;;  %s4639_s26 = smov %s3697_s27 }
 0x8af   : > { %s4636_s29 = sld [smem:[#allocation11_spill]]  ;;  %34 = sbr.rel (!%p32_p0) target bundleno = 20 (0x14), region = 171 }
 0x8b0   : > { %s4637_s0 = sld [smem:[#allocation13_spill]] }
 0x8b1   : > { %s4638_s4 = sld [smem:[#allocation15_spill]] }
 0x8b2   : > { %s4640_s27 = smov %s4633_s10 }
 0x8b4   :  { %2650 = vsyncpa [#allocation5], 1 }
 0x8b5   :  { %2652 = vsyncpa [#allocation5 + $0x1], 1 }

</bundles_post_ra>
